<compile_context>
chip_gen: v7x
topology: tpu7x:2x2x1
jax: 0.10.0
libtpu: 0.0.40
codegen_flags: <defaults>
</compile_context>

<pallas_src>
import functools

import numpy as np
import jax
import jax.numpy as jnp
from jax.experimental import pallas as pl
from jax.experimental.pallas import tpu as pltpu


# --------------------------------------------------------------------------
# Pallas kernel: streaming min/argmin over N-tiles of the distance matrix
# --------------------------------------------------------------------------
def _nn_index_kernel(x_ref, c_ref, out_ref, min_sc, iota_sc, *, tn, sentinel):
    # x_ref  : (1, TN, 8) f32  augmented point rows of this N-tile
    # c_ref  : (1, 8, TM) f32  augmented centroid columns of this M-tile
    # out_ref: (1, 1, TM) i32  running / final argmin (resident across N axis)
    # min_sc : (1, TM) f32     running column minimum
    # iota_sc: (TN, TM) i32    cached row-iota (filled once per (b, m) column)
    ni = pl.program_id(2)

    @pl.when(ni == 0)
    def _init():
        min_sc[...] = jnp.full_like(min_sc, jnp.inf)
        out_ref[...] = jnp.zeros_like(out_ref)
        iota_sc[...] = jax.lax.broadcasted_iota(jnp.int32, iota_sc.shape, 0)

    # Squared distances on the MXU: |p|^2 + |c|^2 - 2 p.c (no clamp: argmin
    # is monotone-invariant and clamping only creates artificial ties).
    dist = jnp.dot(x_ref[0], c_ref[0],
                   preferred_element_type=jnp.float32,
                   precision=jax.lax.Precision.HIGHEST)          # (TN, TM)

    # First-occurrence argmin within this tile: one sublane min, one
    # compare+select against the cached iota, one sublane min.
    tile_min = jnp.min(dist, axis=0, keepdims=True)              # (1, TM)
    cand = jnp.where(dist <= tile_min, iota_sc[...], jnp.int32(sentinel))
    tile_arg = jnp.min(cand, axis=0, keepdims=True) + ni * tn    # (1, TM)

    # Streaming update.  Strict '<' keeps the first occurrence across tiles
    # (N-tiles are visited in increasing order).
    better = tile_min < min_sc[...]
    min_sc[...] = jnp.where(better, tile_min, min_sc[...])
    out_ref[0] = jnp.where(better, tile_arg, out_ref[0])


@jax.jit
def _nn_index_device(xyz, sampled, n_true):
    """xyz: (B, N_pad, 3) f32 (zero-padded), sampled: (B, M_pad, 3) f32,
    n_true: scalar number of real points.  Returns (B, M_pad) int32."""
    B, n_pad, _ = xyz.shape
    m_pad = sampled.shape[1]
    f32 = jnp.float32

    # Augmented point rows: [-2x, -2y, -2z, |p|^2, 1, 0, 0, 0]; padded rows
    # get an "infinitely far" |p|^2 so they never win the argmin.
    psq = jnp.sum(xyz * xyz, axis=-1, keepdims=True)              # (B, N_pad, 1)
    valid = (jnp.arange(n_pad) < n_true)[None, :, None]
    psq = jnp.where(valid, psq, jnp.float32(1e30))
    x_aug = jnp.concatenate(
        [-2.0 * xyz, psq, jnp.ones((B, n_pad, 1), f32),
         jnp.zeros((B, n_pad, 3), f32)], axis=-1)                 # (B, N_pad, 8)

    # Augmented centroid columns: [cx, cy, cz, 1, |c|^2, 0, 0, 0]^T.
    # Padded (zero) centroid columns yield garbage indices that are stripped
    # on the host, so they need no masking.
    csq = jnp.sum(sampled * sampled, axis=-1, keepdims=True)      # (B, M_pad, 1)
    c_rows = jnp.concatenate(
        [sampled, jnp.ones((B, m_pad, 1), f32), csq,
         jnp.zeros((B, m_pad, 3), f32)], axis=-1)                 # (B, M_pad, 8)
    c_aug = jnp.transpose(c_rows, (0, 2, 1))                      # (B, 8, M_pad)

    tn = min(1024, n_pad)         # n_pad is a power of two >= 8
    tm = min(1024, m_pad)         # m_pad is a power of two >= 128
    grid = (B, m_pad // tm, n_pad // tn)

    kernel = functools.partial(_nn_index_kernel, tn=tn, sentinel=n_pad)
    out = pl.pallas_call(
        kernel,
        out_shape=jax.ShapeDtypeStruct((B, 1, m_pad), jnp.int32),
        grid=grid,
        in_specs=[
            # TODO(synk): last dim of 8 on the x block is lane-sparse; verify
            # the lowering with pl.lower_as_mlir if DMA ever shows up hot.
            pl.BlockSpec((1, tn, 8), lambda b, m, n: (b, n, 0)),
            pl.BlockSpec((1, 8, tm), lambda b, m, n: (b, 0, m)),
        ],
        out_specs=pl.BlockSpec((1, 1, tm), lambda b, m, n: (b, 0, m)),
        scratch_shapes=[
            pltpu.VMEM((1, tm), jnp.float32),    # running min
            pltpu.VMEM((tn, tm), jnp.int32),     # cached row-iota
        ],
        compiler_params=pltpu.CompilerParams(
            dimension_semantics=("parallel", "parallel", "arbitrary"),
            vmem_limit_bytes=48 * 1024 * 1024,
        ),
    )(x_aug, c_aug)
    return out.reshape(B, m_pad)


def nn_index_pallas(xyz, sampled):
    """xyz: (B, N, 3) f32, sampled: (B, M, 3) f32 -> (B, M) int32 nearest-point index."""
    xyz = np.asarray(xyz, dtype=np.float32)
    sampled = np.asarray(sampled, dtype=np.float32)
    B, N, _ = xyz.shape
    M = sampled.shape[1]

    # Bucket padded sizes to powers of two so varying point-cloud / voxel
    # counts hit the same jit/Mosaic compilation.
    n_pad = max(8, pl.next_power_of_2(int(N)))
    m_pad = max(128, pl.next_power_of_2(int(M)))

    xyz_p = np.zeros((B, n_pad, 3), dtype=np.float32)
    xyz_p[:, :N] = xyz
    smp_p = np.zeros((B, m_pad, 3), dtype=np.float32)
    smp_p[:, :M] = sampled

    out = _nn_index_device(jnp.asarray(xyz_p), jnp.asarray(smp_p),
                           jnp.int32(N))
    out = np.asarray(jax.block_until_ready(out))
    return out[:, :M]                 # strip padded centroid columns


# --------------------------------------------------------------------------
# Host-side AVSNet glue (mirrors the PyTorch module's eager, dynamic-shape code)
# --------------------------------------------------------------------------
class AVSNetPallas:
    def __init__(self, V0=0.02, Kp=0.5, Ki=0.1, max_iter=10):
        self.V0 = float(V0)
        self.Kp = float(Kp)
        self.Ki = float(Ki)
        self.max_iter = int(max_iter)

    def voxel_downsample(self, xyz, voxel_size):
        # xyz: np.ndarray (B, N, 3) float32
        B, N, C = xyz.shape
        results = []
        for b in range(B):
            coords = np.floor(xyz[b] / voxel_size).astype(np.int64)
            # Same hash as the PyTorch reference (kept for parity, collisions
            # and all).
            keys = coords[:, 0] * 1000000 + coords[:, 1] * 1000 + coords[:, 2]
            uniq, inverse = np.unique(keys, return_inverse=True)
            m = len(uniq)
            centroids = np.zeros((m, C), dtype=np.float32)
            count = np.zeros((m,), dtype=np.float32)
            np.add.at(centroids, inverse, xyz[b].astype(np.float32))
            np.add.at(count, inverse, 1.0)
            centroids = centroids / np.maximum(count, 1.0)[:, None]
            results.append(centroids)
        max_length = max(len(r) for r in results)
        padded = []
        for r in results:
            if len(r) < max_length:
                pad = np.zeros((max_length - len(r), C), dtype=np.float32)
                r = np.concatenate([r, pad], axis=0)
            padded.append(r)
        return np.stack(padded).astype(np.float32)     # (B, M, 3)

    def adapt_voxel_size(self, xyz, npoint):
        B, N, _ = xyz.shape
        target_ratio = N / npoint
        scale = 0.0
        sum_err = 0.0
        voxel_size = self.V0
        for _ in range(self.max_iter):
            voxel_size = self.V0 * float(np.exp(scale))
            sampled = self.voxel_downsample(xyz, voxel_size)
            current_ratio = N / sampled.shape[1]
            err = target_ratio - current_ratio
            sum_err += err
            diff = self.Kp * err + self.Ki * sum_err
            scale += 0.01 * (1.0 / (1.0 + np.exp(-diff)) - 0.5)
            if abs(sampled.shape[1] - npoint) <= npoint * 0.1:
                break
        return voxel_size

    def __call__(self, xyz, npoint, rng):
        # xyz: np.ndarray (B, N, 3) float32 ; returns (B, npoint) int32
        xyz = np.asarray(xyz, dtype=np.float32)
        B, N, _ = xyz.shape
        voxel_size = self.adapt_voxel_size(xyz, npoint)
        sampled = self.voxel_downsample(xyz, voxel_size)          # (B, M, 3)

        # Hot path on TPU: tiled pairwise squared distance + streaming argmin.
        indices = nn_index_pallas(xyz, sampled)                   # (B, M) int32

        M = indices.shape[1]
        if M > npoint:
            # TODO(synk): torch.randperm replaced by a deterministic NumPy
            # Generator permutation (RNG streams differ from PyTorch).
            out = np.stack(
                [indices[b][rng.permutation(M)[:npoint]] for b in range(B)]
            )
        elif M < npoint:
            pad = np.repeat(indices[:, -1:], npoint - M, axis=1)
            out = np.concatenate([indices, pad], axis=1)
        else:
            out = indices
        return out.astype(np.int32)


# --------------------------------------------------------------------------
if __name__ == "__main__":
    # --- small end-to-end run through the AVSNet glue ---------------------
    B, N, npoint = 2, 256, 64
    xyz = jax.random.uniform(jax.random.PRNGKey(0), (B, N, 3), dtype=jnp.float32)
    xyz_np = np.asarray(xyz)

    model = AVSNetPallas()
    rng = np.random.default_rng(0)
    idx = model(xyz_np, npoint, rng)
    assert idx.shape == (B, npoint)
    assert (idx >= 0).all() and (idx < N).all()

    # --- kernel-only check exercising multiple N- and M-tiles -------------
    k1, k2 = jax.random.split(jax.random.PRNGKey(0))
    Nk, Mk = 1300, 1300      # -> N_pad = M_pad = 2048, 2x2 tile grid per batch
    pts = np.asarray(jax.random.uniform(k1, (B, Nk, 3), dtype=jnp.float32))
    cen = np.asarray(jax.random.uniform(k2, (B, Mk, 3), dtype=jnp.float32))
    got = nn_index_pallas(pts, cen)                               # (B, Mk)
    assert got.shape == (B, Mk)
    assert (got >= 0).all() and (got < Nk).all()

    # Tie-robust correctness: distance at the chosen index equals the column
    # minimum up to the f32 tolerance of the expanded-form distance.
    for b in range(B):
        d = ((pts[b].astype(np.float64)[:, None, :]
              - cen[b].astype(np.float64)[None, :, :]) ** 2).sum(-1)   # (Nk, Mk)
        chosen = d[got[b], np.arange(Mk)]
        np.testing.assert_allclose(chosen, d.min(axis=0), rtol=1e-4, atol=1e-4)

    print("KERNEL_OK")
</pallas_src>

<mosaic_0001>
module attributes {stable_mosaic.version = 11 : i64} {
  func.func @_nn_index_kernel(%arg0: i32, %arg1: i32, %arg2: i32, %arg3: memref<1x256x8xf32, #tpu.memory_space<vmem>>, %arg4: memref<1x8x256xf32, #tpu.memory_space<vmem>>, %arg5: memref<1x1x256xi32, #tpu.memory_space<vmem>>, %arg6: memref<1x256xf32, #tpu.memory_space<vmem>>, %arg7: memref<256x256xi32, #tpu.memory_space<vmem>>) attributes {dimension_semantics = [#tpu.dimension_semantics<parallel>, #tpu.dimension_semantics<parallel>, #tpu.dimension_semantics<arbitrary>], iteration_bounds = array<i64: 2, 1, 1>, scalar_prefetch = 0 : i64, scratch_operands = 2 : i64, tpu.core_type = #tpu.core_type<tc>, window_params = [{transform_indices = @transform_0, window_bounds = array<i64: 1, 256, 8>}, {transform_indices = @transform_1, window_bounds = array<i64: 1, 8, 256>}, {transform_indices = @transform_2, window_bounds = array<i64: 1, 1, 256>}]} {
    %c0_i32 = arith.constant 0 : i32
    %0 = arith.cmpi eq, %arg2, %c0_i32 : i32
    %1 = arith.extui %0 : i1 to i32
    %c0_i32_0 = arith.constant 0 : i32
    %2 = arith.cmpi ne, %1, %c0_i32_0 : i32
    scf.if %2 {
      %cst_23 = arith.constant 0x7F800000 : f32
      %31 = vector.broadcast %cst_23 : f32 to vector<1x256xf32>
      %c0_24 = arith.constant 0 : index
      %c0_25 = arith.constant 0 : index
      %32 = vector.load %arg6[%c0_24, %c0_25] : memref<1x256xf32, #tpu.memory_space<vmem>>, vector<1x256xf32>
      tpu.vector_store %arg6[%c0_24, %c0_25], %31 {strides = array<i32>} : memref<1x256xf32, #tpu.memory_space<vmem>>, vector<1x256xf32>,
      %c0_i32_26 = arith.constant 0 : i32
      %33 = vector.broadcast %c0_i32_26 : i32 to vector<1x1x256xi32>
      %c0_27 = arith.constant 0 : index
      %c0_28 = arith.constant 0 : index
      %c0_29 = arith.constant 0 : index
      %34 = vector.load %arg5[%c0_27, %c0_28, %c0_29] : memref<1x1x256xi32, #tpu.memory_space<vmem>>, vector<1x1x256xi32>
      tpu.vector_store %arg5[%c0_27, %c0_28, %c0_29], %33 {strides = array<i32>} : memref<1x1x256xi32, #tpu.memory_space<vmem>>, vector<1x1x256xi32>,
      %35 = tpu.iota {dimensions = array<i32: 0>} : vector<256x256xi32>
      %c0_30 = arith.constant 0 : index
      %c0_31 = arith.constant 0 : index
      %36 = vector.load %arg7[%c0_30, %c0_31] : memref<256x256xi32, #tpu.memory_space<vmem>>, vector<256x256xi32>
      tpu.vector_store %arg7[%c0_30, %c0_31], %35 {strides = array<i32>} : memref<256x256xi32, #tpu.memory_space<vmem>>, vector<256x256xi32>,
    } else {
    }
    %c0 = arith.constant 0 : index
    %c0_1 = arith.constant 0 : index
    %c0_2 = arith.constant 0 : index
    %3 = vector.load %arg3[%c0, %c0_1, %c0_2] : memref<1x256x8xf32, #tpu.memory_space<vmem>>, vector<1x256x8xf32>
    %4 = vector.shape_cast %3 : vector<1x256x8xf32> to vector<256x8xf32>
    %c0_3 = arith.constant 0 : index
    %c0_4 = arith.constant 0 : index
    %c0_5 = arith.constant 0 : index
    %5 = vector.load %arg4[%c0_3, %c0_4, %c0_5] : memref<1x8x256xf32, #tpu.memory_space<vmem>>, vector<1x8x256xf32>
    %6 = vector.shape_cast %5 : vector<1x8x256xf32> to vector<8x256xf32>
    %cst = arith.constant dense<0.000000e+00> : vector<256x256xf32>
    %7 = tpu.matmul %4, %6, %cst {dimension_numbers = #tpu.dot_dimension_numbers<[1], [0], [0], [1], [0, 0, 1, 1], [], []>, precision = #tpu.contract_precision<fp32>} : vector<256x8xf32>, vector<8x256xf32>, vector<256x256xf32> -> vector<256x256xf32>
    %cst_6 = arith.constant dense<0x7F800000> : vector<256xf32>
    %8 = vector.multi_reduction <minimumf>, %7, %cst_6 [0] : vector<256x256xf32> to vector<256xf32>
    %9 = vector.shape_cast %8 : vector<256xf32> to vector<1x256xf32>
    %10 = vector.broadcast %9 : vector<1x256xf32> to vector<256x256xf32>
    %11 = arith.cmpf ole, %7, %10 : vector<256x256xf32>
    %c0_7 = arith.constant 0 : index
    %c0_8 = arith.constant 0 : index
    %12 = vector.load %arg7[%c0_7, %c0_8] : memref<256x256xi32, #tpu.memory_space<vmem>>, vector<256x256xi32>
    %c256_i32 = arith.constant 256 : i32
    %13 = vector.broadcast %c256_i32 : i32 to vector<256x256xi32>
    %14 = arith.select %11, %12, %13 : vector<256x256xi1>, vector<256x256xi32>
    %cst_9 = arith.constant dense<2147483647> : vector<256xi32>
    %15 = vector.multi_reduction <minsi>, %14, %cst_9 [0] : vector<256x256xi32> to vector<256xi32>
    %16 = vector.shape_cast %15 : vector<256xi32> to vector<1x256xi32>
    %c256_i32_10 = arith.constant 256 : i32
    %17 = arith.muli %arg2, %c256_i32_10 : i32
    %18 = vector.broadcast %17 : i32 to vector<1x256xi32>
    %19 = arith.addi %16, %18 : vector<1x256xi32>
    %c0_11 = arith.constant 0 : index
    %c0_12 = arith.constant 0 : index
    %20 = vector.load %arg6[%c0_11, %c0_12] : memref<1x256xf32, #tpu.memory_space<vmem>>, vector<1x256xf32>
    %21 = arith.cmpf olt, %9, %20 : vector<1x256xf32>
    %c0_13 = arith.constant 0 : index
    %c0_14 = arith.constant 0 : index
    %22 = vector.load %arg6[%c0_13, %c0_14] : memref<1x256xf32, #tpu.memory_space<vmem>>, vector<1x256xf32>
    %23 = arith.select %21, %9, %22 : vector<1x256xi1>, vector<1x256xf32>
    %c0_15 = arith.constant 0 : index
    %c0_16 = arith.constant 0 : index
    %24 = vector.load %arg6[%c0_15, %c0_16] : memref<1x256xf32, #tpu.memory_space<vmem>>, vector<1x256xf32>
    tpu.vector_store %arg6[%c0_15, %c0_16], %23 {strides = array<i32>} : memref<1x256xf32, #tpu.memory_space<vmem>>, vector<1x256xf32>,
    %c0_17 = arith.constant 0 : index
    %c0_18 = arith.constant 0 : index
    %c0_19 = arith.constant 0 : index
    %25 = vector.load %arg5[%c0_17, %c0_18, %c0_19] : memref<1x1x256xi32, #tpu.memory_space<vmem>>, vector<1x1x256xi32>
    %26 = vector.shape_cast %25 : vector<1x1x256xi32> to vector<1x256xi32>
    %27 = arith.select %21, %19, %26 : vector<1x256xi1>, vector<1x256xi32>
    %c0_20 = arith.constant 0 : index
    %c0_21 = arith.constant 0 : index
    %c0_22 = arith.constant 0 : index
    %28 = vector.load %arg5[%c0_20, %c0_21, %c0_22] : memref<1x1x256xi32, #tpu.memory_space<vmem>>, vector<1x1x256xi32>
    %29 = vector.shape_cast %28 : vector<1x1x256xi32> to vector<1x256xi32>
    %30 = vector.shape_cast %27 : vector<1x256xi32> to vector<1x1x256xi32>
    tpu.vector_store %arg5[%c0_20, %c0_21, %c0_22], %30 {strides = array<i32>} : memref<1x1x256xi32, #tpu.memory_space<vmem>>, vector<1x1x256xi32>,
    return
  }
  func.func @transform_0(%arg0: i32, %arg1: i32, %arg2: i32) -> (i32, i32, i32) {
    %c0_i32 = arith.constant 0 : i32
    %c0_i32_0 = arith.constant 0 : i32
    return %arg0, %arg2, %c0_i32 : i32, i32, i32
  }
  func.func @transform_1(%arg0: i32, %arg1: i32, %arg2: i32) -> (i32, i32, i32) {
    %c0_i32 = arith.constant 0 : i32
    %c0_i32_0 = arith.constant 0 : i32
    return %arg0, %c0_i32, %arg1 : i32, i32, i32
  }
  func.func @transform_2(%arg0: i32, %arg1: i32, %arg2: i32) -> (i32, i32, i32) {
    %c0_i32 = arith.constant 0 : i32
    %c0_i32_0 = arith.constant 0 : i32
    return %arg0, %c0_i32, %arg1 : i32, i32, i32
  }
}

</mosaic_0001>

<bundles_post_ra>
// kernel: _nn_index_device.1
= control target key start
LH: loop header
LB: loop body
LE: loop exit
PB: predicated region body
PF: predicated region fallthrough
CT: control target
= control target key end

     0   :  { %s3431_s9 = smov 0   ;;  %s3433_s10 = smov 0   ;;  %s5094_s0 = inlined_call_operand.vmem [shape: f32[2,256,8], index: 0, kind: input, shape index: {}]   ;;  %s5095_s1 = inlined_call_operand.vmem [shape: f32[2,8,256], index: 1, kind: input, shape index: {}]   ;;  %s5096_s2 = inlined_call_operand.vmem [shape: s32[2,1,256], index: 2, kind: output, shape index: {}]  }
   0x1   :  { %s3435_s11 = smov 0  }
   0x2 LB: > { %s31_s12 = sadd.s32 1, %s3406_s10  ;;  %p3030_p0 = scmp.ge.s32.totalorder %s3410_s11, 1  ;;  %s3410_s11 = sphi %s3435_s11, %s12_s11   ;;  %s3406_s10 = sphi %s3433_s10, %s5401_s10   ;;  %s3402_s9 = sphi %s3431_s9, %s5400_s9  }
   0x3   : > { %p33_p1 = scmp.ge.s32.totalorder %s31_s12, 2  ;;  %p157_p2 = scmp.lt.s32.totalorder %s3410_s11, 3 }
   0x5   : > { %s5403_s12 = smov (%p33_p1, %s31_s12), 0  ;;  %p158_p3 = pnand %p3030_p0, %p157_p2 }
   0x7   : > { %161 = sbr.rel (%p158_p3) target bundleno = 746 (0x2ea), region = 28 }
   0xe   : > { %p196_p4 = scmp.lt.s32.totalorder %s3402_s9, 1  ;;  %v5097_v0 = vlaneseq  ;;  %v3412_v1 = vmov 0.0   ;;  %v5200_v2 = vmov 0  ;;  %v3413_v3 = vmov inf  }
   0xf   : > { %1571 = vmatprep.mubr.f32.mxu0 %v3412_v1  ;;  %528 = vmatprep.mubr.f32.mxu1 %v3412_v1  ;;  %vm365_vm1 = vcmask 64512   ;;  %v3414_v13 = vmov 0  }
  0x10   : > { %s5405_s9 = smov (!%p196_p4, %s3402_s9), 1  ;;  %vm3452_vm0 = vcmp.lt.s32.totalorder %v5097_v0, 256 }
  0x11   : > { %v5201_v2 = vsel %vm3452_vm0, 4294967295, %v5200_v2  ;;  %232 = vst.msk [vmem:[#allocation2] sm:$0x3] %vm3452_vm0, %v3413_v3  ;;  %s3038_s13 = sshll.u32 %s5405_s9, 8  ;;  %s3039_s14 = sshll.u32 %s5405_s9, 4 }
  0x12   : > { %5202 = vst [vmem:[#allocation4_spill] sm:$0xff] %v5201_v2  ;;  %s3461_s17 = scalar_lea.vmem %s5094_s0, %s3038_s13  ;;  %s213_s20 = scalar_lea.vmem %s5095_s1, %s3039_s14 }
  0x13   : > { %s3035_s21 = sshll.u32 %s5405_s9, 1  ;;  %v364_v4 = vld [vmem:[%s213_s20 + $0x8] sm:$0xff]  ;;  %v363_v5 = vld [vmem:[%s213_s20] sm:$0xff]  ;;  %v333_v11 = vld [vmem:[%s3461_s17 + $0x10] sm:$0xff] }
  0x14   : > { %v331_v6 = vld [vmem:[%s3461_s17] sm:$0xff]  ;;  %s3470_s24 = scalar_lea.vmem %s5096_s2, %s3035_s21  ;;  %v462_v7 = vand.u32 4294901760, %v364_v4  ;;  %v3472_v8 = vand.u32 4294901760, %v363_v5  ;;  %v332_v10 = vld [vmem:[%s3461_s17 + $0x8] sm:$0xff]  ;;  %v334_v12 = vld [vmem:[%s3461_s17 + $0x18] sm:$0xff]  ;;  %v373_v16 = vsel %vm365_vm1, %v333_v11, 0 }
  0x15   : > { %v367_v9 = vsel %vm365_vm1, %v331_v6, 0  ;;  %233 = vst.msk [vmem:[%s3470_s24] sm:$0x3] %vm3452_vm0, %v3414_v13  ;;  %v370_v15 = vsel %vm365_vm1, %v332_v10, 0  ;;  %v376_v17 = vsel %vm365_vm1, %v334_v12, 0  ;;  %v335_v18 = vld [vmem:[%s3461_s17 + $0x20] sm:$0xff] }
  0x16   : > { %v3481_v14 = vand.u32 4294901760, %v367_v9  ;;  %1506 = vmatprep.subr.mxu0 %v462_v7  ;;  %v3488_v19 = vsub.f32 %v363_v5, %v3472_v8  ;;  %463 = vmatprep.subr.mxu1 %v462_v7  ;;  %v882_v20 = vsub.f32 %v364_v4, %v462_v7  ;;  %v3490_v21 = vand.u32 4294901760, %v370_v15  ;;  %v336_v30 = vld [vmem:[%s3461_s17 + $0x28] sm:$0xff]  ;;  %v337_v44 = vld [vmem:[%s3461_s17 + $0x30] sm:$0xff]  ;;  %v338_v51 = vld [vmem:[%s3461_s17 + $0x38] sm:$0xff] }
  0x17   : > { %v3492_v22 = vand.u32 4294901760, %v373_v16  ;;  %1508 = vmatpush1.msra.mxu0 %v3472_v8  ;;  %465 = vmatpush1.msra.mxu1 %v3472_v8  ;;  %v3499_v24 = vand.u32 4294901760, %v376_v17  ;;  %v379_v25 = vsel %vm365_vm1, %v335_v18, 0  ;;  %v382_v39 = vsel %vm365_vm1, %v336_v30, 0  ;;  %v339_v58 = vld [vmem:[%s3461_s17 + $0x40] sm:$0xff]  ;;  %v340_v3 = vld [vmem:[%s3461_s17 + $0x48] sm:$0xff] }
  0x18   : > { %v3496_v23 = vsub.f32 %v367_v9, %v3481_v14  ;;  %v883_v26 = vand.u32 4294901760, %v882_v20  ;;  %v889_v27 = vand.u32 4294901760, %v3488_v19  ;;  %v3504_v28 = vsub.f32 %v370_v15, %v3490_v21  ;;  %v347_v5 = vld [vmem:[%s3461_s17 + $0x80] sm:$0xff]  ;;  %v348_v10 = vld [vmem:[%s3461_s17 + $0x88] sm:$0xff]  ;;  %v349_v11 = vld [vmem:[%s3461_s17 + $0x90] sm:$0xff] }
  0x19   : > { %v3507_v29 = vsub.f32 %v373_v16, %v3492_v22  ;;  %v3513_v35 = vand.u32 4294901760, %v379_v25  ;;  %v3518_v38 = vsub.f32 %v376_v17, %v3499_v24  ;;  %v3527_v46 = vand.u32 4294901760, %v382_v39  ;;  %v350_v12 = vld [vmem:[%s3461_s17 + $0x98] sm:$0xff]  ;;  %v341_v17 = vld [vmem:[%s3461_s17 + $0x50] sm:$0xff] }
  0x1a   : > { %v531_v31 = vand.u32 4294901760, %v3496_v23  ;;  %v884_v32 = vsub.f32 %v882_v20, %v883_v26  ;;  %1863 = vmatprep.subr.mxu0 %v883_v26  ;;  %v890_v33 = vsub.f32 %v3488_v19, %v889_v27  ;;  %v542_v34 = vand.u32 4294901760, %v3504_v28 }
  0x1b   : > { %v553_v37 = vand.u32 4294901760, %v3507_v29  ;;  %v3525_v45 = vsub.f32 %v379_v25, %v3513_v35  ;;  %v564_v49 = vand.u32 4294901760, %v3518_v38  ;;  %v385_v50 = vsel %vm365_vm1, %v337_v44, 0 }
  0x1c   : > { %1575 = vmatmul.mubr.f32.vlgmr.msra.gmra.mrb[0].mxu0 %v531_v31  ;;  %v532_v36 = vsub.f32 %v3496_v23, %v531_v31  ;;  %v885_v40 = vand.u32 4294901760, %v884_v32  ;;  %v891_v41 = vand.u32 4294901760, %v890_v33  ;;  %v543_v42 = vsub.f32 %v3504_v28, %v542_v34  ;;  %v352_v33 = vld [vmem:[%s3461_s17 + $0xa8] sm:$0xff] }
  0x1d   : > { %1580 = vmatprep.mubr.f32.mxu0 %v3412_v1  ;;  %1867 = vmatpush1.msra.mxu0 %v889_v27  ;;  %v554_v48 = vsub.f32 %v3507_v29, %v553_v37  ;;  %v575_v52 = vand.u32 4294901760, %v3525_v45  ;;  %v3537_v53 = vsub.f32 %v382_v39, %v3527_v46  ;;  %v565_v55 = vsub.f32 %v3518_v38, %v564_v49  ;;  %v342_v39 = vld [vmem:[%s3461_s17 + $0x58] sm:$0xff] }
  0x1e   : > { %v533_v43 = vand.u32 4294901760, %v532_v36  ;;  %2156 = vmatprep.subr.mxu0 %v462_v7  ;;  %886 = vmatprep.subr.mxu1 %v885_v40  ;;  %v544_v47 = vand.u32 4294901760, %v543_v42  ;;  %v3540_v56 = vand.u32 4294901760, %v385_v50  ;;  %v388_v57 = vsel %vm365_vm1, %v338_v51, 0  ;;  %v353_v42 = vld [vmem:[%s3461_s17 + $0xb0] sm:$0xff]  ;;  %v354_v51 = vld [vmem:[%s3461_s17 + $0xb8] sm:$0xff] }
  0x1f   : > { %v555_v54 = vand.u32 4294901760, %v554_v48  ;;  %v576_v59 = vsub.f32 %v3525_v45, %v575_v52  ;;  %v586_v60 = vand.u32 4294901760, %v3537_v53  ;;  %v566_v61 = vand.u32 4294901760, %v565_v55 }
  0x20   : > { %534 = vmatmul.mubr.f32.vlgmr.msra.gmra.mrb[0].mxu1 %v533_v43  ;;  %1584 = vmatmul.mubr.f32.gmra.mrb[2].mxu0 %v542_v34  ;;  %v3549_v62 = vsub.f32 %v385_v50, %v3540_v56  ;;  %v3551_v63 = vand.u32 4294901760, %v388_v57  ;;  %v391_v4 = vsel %vm365_vm1, %v339_v58, 0  ;;  %v394_v9 = vsel %vm365_vm1, %v340_v3, 0  ;;  %v357_v3 = vld [vmem:[%s3461_s17 + $0xd0] sm:$0xff] }
  0x21   : > { %892 = vmatpush1.msra.mxu1 %v891_v41  ;;  %539 = vmatprep.mubr.f32.mxu1 %v3412_v1  ;;  %v577_v6 = vand.u32 4294901760, %v576_v59  ;;  %v587_v7 = vsub.f32 %v3537_v53, %v586_v60  ;;  %v3567_v16 = vand.u32 4294901760, %v391_v4  ;;  %v3571_v18 = vsel %vm365_vm1, %v347_v5, 0 }
  0x22   : > { %1589 = vmatprep.mubr.f32.mxu0 %v3412_v1  ;;  %1182 = vmatprep.subr.mxu1 %v882_v20  ;;  %v597_v13 = vand.u32 4294901760, %v3549_v62  ;;  %v3565_v15 = vsub.f32 %v388_v57, %v3551_v63  ;;  %v351_v20 = vld [vmem:[%s3461_s17 + $0xa0] sm:$0xff]  ;;  %v3577_v25 = vsel %vm365_vm1, %v348_v10, 0  ;;  %v3580_v26 = vsel %vm365_vm1, %v349_v11, 0  ;;  %v356_v57 = vld [vmem:[%s3461_s17 + $0xc8] sm:$0xff]  ;;  %v358_v10 = vld [vmem:[%s3461_s17 + $0xd8] sm:$0xff] }
  0x23   : > { %v3583_v27 = vsel %vm365_vm1, %v350_v12, 0  ;;  %v588_v30 = vand.u32 4294901760, %v587_v7  ;;  %v3585_v31 = vand.u32 4294901760, %v394_v9  ;;  %v397_v32 = vsel %vm365_vm1, %v341_v17, 0  ;;  %v359_v11 = vld [vmem:[%s3461_s17 + $0xe0] sm:$0xff]  ;;  %v344_v12 = vld [vmem:[%s3461_s17 + $0x68] sm:$0xff] }
  0x24   : > { %545 = vmatmul.mubr.f32.gmra.mrb[2].mxu1 %v544_v47  ;;  %1593 = vmatmul.mubr.f32.gmra.mrb[4].mxu0 %v553_v37  ;;  %v598_v34 = vsub.f32 %v3549_v62, %v597_v13  ;;  %v608_v36 = vand.u32 4294901760, %v3565_v15  ;;  %v3592_v37 = vsub.f32 %v391_v4, %v3567_v16  ;;  %v3596_v40 = vsel %vm365_vm1, %v351_v20, 0 }
  0x25   : > { %550 = vmatprep.mubr.f32.mxu1 %v3412_v1  ;;  %1598 = vmatprep.mubr.f32.mxu0 %v3412_v1  ;;  %v3601_v41 = vsel %vm365_vm1, %v352_v33, 0  ;;  %v3604_v43 = vand.u32 4294901760, %v397_v32  ;;  %v400_v44 = vsel %vm365_vm1, %v342_v39, 0  ;;  %v3610_v50 = vsub.f32 %v394_v9, %v3585_v31 }
  0x26   : > { %v599_v47 = vand.u32 4294901760, %v598_v34  ;;  %v609_v48 = vsub.f32 %v3565_v15, %v608_v36  ;;  %v3618_v55 = vsel %vm365_vm1, %v353_v42, 0  ;;  %v3624_v59 = vand.u32 4294901760, %v400_v44 }
  0x27   : > { %v3622_v58 = vsub.f32 %v397_v32, %v3604_v43  ;;  %v3639_v9 = vsel %vm365_vm1, %v356_v57, 0  ;;  %v360_v32 = vld [vmem:[%s3461_s17 + $0xe8] sm:$0xff]  ;;  %v3659_v39 = vsel %vm365_vm1, %v359_v11, 0  ;;  %v406_v42 = vsel %vm365_vm1, %v344_v12, 0 }
  0x28   : > { %556 = vmatmul.mubr.f32.gmra.mrb[4].mxu1 %v555_v54  ;;  %1602 = vmatmul.mubr.f32.gmra.mrb[6].mxu0 %v564_v49  ;;  %v619_v49 = vand.u32 4294901760, %v3592_v37  ;;  %v343_v54 = vld [vmem:[%s3461_s17 + $0x60] sm:$0xff]  ;;  %v610_v4 = vand.u32 4294901760, %v609_v48  ;;  %v3649_v20 = vsub.f32 %v400_v44, %v3624_v59  ;;  %v345_v44 = vld [vmem:[%s3461_s17 + $0x70] sm:$0xff]  ;;  %v3674_v57 = vand.u32 4294901760, %v406_v42 }
  0x29   : > { %561 = vmatprep.mubr.f32.mxu1 %v3412_v1  ;;  %1607 = vmatprep.mubr.f32.mxu0 %v3412_v1  ;;  %v403_v7 = vsel %vm365_vm1, %v343_v54, 0  ;;  %v641_v17 = vand.u32 4294901760, %v3622_v58  ;;  %v361_v48 = vld [vmem:[%s3461_s17 + $0xf0] sm:$0xff]  ;;  %v3739_v0 = vand.u32 4294901760, %v3583_v27 }
  0x2a   : > { %v620_v5 = vsub.f32 %v3592_v37, %v619_v49  ;;  %v652_v54 = vand.u32 4294901760, %v3649_v20 }
  0x2c   : > { %567 = vmatmul.mubr.f32.gmra.mrb[6].mxu1 %v566_v61  ;;  %1611 = vmatmul.mubr.f32.gmra.mrb[8].mxu0 %v575_v52  ;;  %v355_v52 = vld [vmem:[%s3461_s17 + $0xc0] sm:$0xff]  ;;  %v621_v33 = vand.u32 4294901760, %v620_v5  ;;  %v3681_v5 = vsel %vm365_vm1, %v361_v48, 0  ;;  %v653_v12 = vsub.f32 %v3649_v20, %v652_v54 }
  0x2d   : > { %572 = vmatprep.mubr.f32.mxu1 %v3412_v1  ;;  %1616 = vmatprep.mubr.f32.mxu0 %v3412_v1  ;;  %v3630_v61 = vsel %vm365_vm1, %v355_v52, 0  ;;  %v642_v52 = vsub.f32 %v3622_v58, %v641_v17 }
  0x2e   : > { %v654_v48 = vand.u32 4294901760, %v653_v12 }
  0x2f   : > { %v643_v11 = vand.u32 4294901760, %v642_v52  ;;  %v3707_v52 = vand.u32 4294901760, %v3571_v18 }
  0x30   : > { %578 = vmatmul.mubr.f32.gmra.mrb[8].mxu1 %v577_v6  ;;  %1620 = vmatmul.mubr.f32.gmra.mrb[10].mxu0 %v586_v60  ;;  %v3627_v60 = vsel %vm365_vm1, %v354_v51, 0  ;;  %v630_v6 = vand.u32 4294901760, %v3610_v50 }
  0x31   : > { %583 = vmatprep.mubr.f32.mxu1 %v3412_v1  ;;  %1625 = vmatprep.mubr.f32.mxu0 %v3412_v1 }
  0x32   : > { %v631_v34 = vsub.f32 %v3610_v50, %v630_v6 }
  0x34   : > { %589 = vmatmul.mubr.f32.gmra.mrb[10].mxu1 %v588_v30  ;;  %1629 = vmatmul.mubr.f32.gmra.mrb[12].mxu0 %v597_v13  ;;  %v3645_v13 = vsel %vm365_vm1, %v357_v3, 0  ;;  %v3651_v30 = vand.u32 4294901760, %v403_v7  ;;  %v632_v51 = vand.u32 4294901760, %v631_v34  ;;  %v362_v3 = vld [vmem:[%s3461_s17 + $0xf8] sm:$0xff] }
  0x35   : > { %594 = vmatprep.mubr.f32.mxu1 %v3412_v1  ;;  %1634 = vmatprep.mubr.f32.mxu0 %v3412_v1 }
  0x38   : > { %600 = vmatmul.mubr.f32.gmra.mrb[12].mxu1 %v599_v47  ;;  %1638 = vmatmul.mubr.f32.gmra.mrb[14].mxu0 %v608_v36  ;;  %v3656_v36 = vsel %vm365_vm1, %v358_v10, 0  ;;  %v3666_v47 = vsel %vm365_vm1, %v360_v32, 0  ;;  %v3686_v10 = vsel %vm365_vm1, %v362_v3, 0  ;;  %v3690_v32 = vsub.f32 %v406_v42, %v3674_v57 }
  0x39   : > { %605 = vmatprep.mubr.f32.mxu1 %v3412_v1  ;;  %1643 = vmatprep.mubr.f32.mxu0 %v3412_v1 }
  0x3c   : > { %611 = vmatmul.mubr.f32.gmra.mrb[14].mxu1 %v610_v4  ;;  %1647 = vmatmul.mubr.f32.gmra.mrb[16].mxu0 %v619_v49  ;;  %v3670_v49 = vsub.f32 %v403_v7, %v3651_v30  ;;  %v409_v4 = vsel %vm365_vm1, %v345_v44, 0  ;;  %v346_v7 = vld [vmem:[%s3461_s17 + $0x78] sm:$0xff] }
  0x3d   : > { %616 = vmatprep.mubr.f32.mxu1 %v3412_v1  ;;  %1652 = vmatprep.mubr.f32.mxu0 %v3412_v1  ;;  %v412_v34 = vsel %vm365_vm1, %v346_v7, 0 }
  0x3e   : > { %v3702_v42 = vand.u32 4294901760, %v412_v34 }
  0x40   : > { %622 = vmatmul.mubr.f32.gmra.mrb[16].mxu1 %v621_v33  ;;  %1656 = vmatmul.mubr.f32.gmra.mrb[18].mxu0 %v630_v6  ;;  %v663_v6 = vand.u32 4294901760, %v3670_v49  ;;  %v3692_v33 = vand.u32 4294901760, %v409_v4 }
  0x41   : > { %627 = vmatprep.mubr.f32.mxu1 %v3412_v1  ;;  %1661 = vmatprep.mubr.f32.mxu0 %v3412_v1 }
  0x42   : > { %v664_v44 = vsub.f32 %v3670_v49, %v663_v6 }
  0x44   : > { %633 = vmatmul.mubr.f32.gmra.mrb[18].mxu1 %v632_v51  ;;  %1665 = vmatmul.mubr.f32.gmra.mrb[20].mxu0 %v641_v17  ;;  %v674_v17 = vand.u32 4294901760, %v3690_v32  ;;  %v3700_v51 = vsub.f32 %v409_v4, %v3692_v33  ;;  %v665_v3 = vand.u32 4294901760, %v664_v44  ;;  %v3718_v4 = vsub.f32 %v3571_v18, %v3707_v52 }
  0x45   : > { %638 = vmatprep.mubr.f32.mxu1 %v3412_v1  ;;  %1670 = vmatprep.mubr.f32.mxu0 %v3412_v1 }
  0x46   : > { %v685_v7 = vand.u32 4294901760, %v3700_v51  ;;  %5203 = vst [vmem:[#allocation5_spill] sm:$0xff] %v3718_v4 }
  0x48   : > { %644 = vmatmul.mubr.f32.gmra.mrb[20].mxu1 %v643_v11  ;;  %1674 = vmatmul.mubr.f32.gmra.mrb[22].mxu0 %v652_v54  ;;  %v675_v54 = vsub.f32 %v3690_v32, %v674_v17  ;;  %v3712_v11 = vsub.f32 %v412_v34, %v3702_v42  ;;  %v3728_v34 = vand.u32 4294901760, %v3580_v26 }
  0x49   : > { %649 = vmatprep.mubr.f32.mxu1 %v3412_v1  ;;  %1679 = vmatprep.mubr.f32.mxu0 %v3412_v1 }
  0x4a   : > { %v676_v12 = vand.u32 4294901760, %v675_v54  ;;  %v696_v44 = vand.u32 4294901760, %v3712_v11  ;;  %v3745_v2 = vsub.f32 %v3580_v26, %v3728_v34 }
  0x4c   : > { %655 = vmatmul.mubr.f32.gmra.mrb[22].mxu1 %v654_v48  ;;  %1683 = vmatmul.mubr.f32.gmra.mrb[24].mxu0 %v663_v6  ;;  %v686_v6 = vsub.f32 %v3700_v51, %v685_v7  ;;  %v3723_v48 = vand.u32 4294901760, %v3577_v25  ;;  %5205 = vst [vmem:[#allocation7_spill] sm:$0xff] %v3745_v2 }
  0x4d   : > { %660 = vmatprep.mubr.f32.mxu1 %v3412_v1  ;;  %1688 = vmatprep.mubr.f32.mxu0 %v3412_v1 }
  0x4e   : > { %v687_v18 = vand.u32 4294901760, %v686_v6  ;;  %v3734_v54 = vsub.f32 %v3577_v25, %v3723_v48  ;;  %v3751_v25 = vsub.f32 %v3583_v27, %v3739_v0 }
  0x50   : > { %666 = vmatmul.mubr.f32.gmra.mrb[24].mxu1 %v665_v3  ;;  %1692 = vmatmul.mubr.f32.gmra.mrb[26].mxu0 %v674_v17  ;;  %v697_v17 = vsub.f32 %v3712_v11, %v696_v44  ;;  %v707_v3 = vand.u32 4294901760, %v3718_v4  ;;  %5204 = vst [vmem:[#allocation6_spill] sm:$0xff] %v3734_v54  ;;  %v718_v6 = vand.u32 4294901760, %v3734_v54  ;;  %5206 = vst [vmem:[#allocation8_spill] sm:$0xff] %v3751_v25  ;;  %v740_v26 = vand.u32 4294901760, %v3751_v25 }
  0x51   : > { %671 = vmatprep.mubr.f32.mxu1 %v3412_v1  ;;  %1697 = vmatprep.mubr.f32.mxu0 %v3412_v1 }
  0x54   : > { %677 = vmatmul.mubr.f32.gmra.mrb[26].mxu1 %v676_v12  ;;  %1701 = vmatmul.mubr.f32.gmra.mrb[28].mxu0 %v685_v7  ;;  %v698_v12 = vand.u32 4294901760, %v697_v17  ;;  %v708_v7 = vsub.f32 %v3718_v4, %v707_v3  ;;  %v729_v17 = vand.u32 4294901760, %v3745_v2  ;;  %v3756_v4 = vand.u32 4294901760, %v3596_v40 }
  0x55   : > { %682 = vmatprep.mubr.f32.mxu1 %v3412_v1  ;;  %1706 = vmatprep.mubr.f32.mxu0 %v3412_v1 }
  0x58   : > { %688 = vmatmul.mubr.f32.gmra.mrb[28].mxu1 %v687_v18  ;;  %1710 = vmatmul.mubr.f32.gmra.mrb[30].mxu0 %v696_v44  ;;  %v709_v44 = vand.u32 4294901760, %v708_v7  ;;  %v719_v18 = vsub.f32 %v3734_v54, %v718_v6  ;;  %v3767_v7 = vand.u32 4294901760, %v3601_v41  ;;  %v741_v54 = vsub.f32 %v3751_v25, %v740_v26 }
  0x59   : > { %693 = vmatprep.mubr.f32.mxu1 %v3412_v1  ;;  %1715 = vmatprep.mubr.f32.mxu0 %v3412_v1  ;;  %v3794_v25 = vand.u32 4294901760, %v3630_v61 }
  0x5a   : > { %v720_v27 = vand.u32 4294901760, %v719_v18  ;;  %v3775_v18 = vsub.f32 %v3601_v41, %v3767_v7  ;;  %v3789_v41 = vand.u32 4294901760, %v3627_v60 }
  0x5c   : > { %699 = vmatmul.mubr.f32.gmra.mrb[30].mxu1 %v698_v12  ;;  %1719 = vmatmul.mubr.f32.gmra.mrb[32].mxu0 %v707_v3  ;;  %v730_v12 = vsub.f32 %v3745_v2, %v729_v17  ;;  %v3764_v3 = vsub.f32 %v3596_v40, %v3756_v4  ;;  %5208 = vst [vmem:[#allocation10_spill] sm:$0xff] %v3775_v18  ;;  %v3778_v40 = vand.u32 4294901760, %v3618_v55  ;;  %v742_v2 = vand.u32 4294901760, %v741_v54 }
  0x5d   : > { %704 = vmatprep.mubr.f32.mxu1 %v3412_v1  ;;  %1724 = vmatprep.mubr.f32.mxu0 %v3412_v1 }
  0x5e   : > { %5207 = vst [vmem:[#allocation9_spill] sm:$0xff] %v3764_v3 }
  0x60   : > { %710 = vmatmul.mubr.f32.gmra.mrb[32].mxu1 %v709_v44  ;;  %1728 = vmatmul.mubr.f32.gmra.mrb[34].mxu0 %v718_v6  ;;  %v731_v44 = vand.u32 4294901760, %v730_v12  ;;  %v751_v6 = vand.u32 4294901760, %v3764_v3  ;;  %v3786_v12 = vsub.f32 %v3618_v55, %v3778_v40  ;;  %v3800_v55 = vsub.f32 %v3627_v60, %v3789_v41 }
  0x61   : > { %715 = vmatprep.mubr.f32.mxu1 %v3412_v1  ;;  %1733 = vmatprep.mubr.f32.mxu0 %v3412_v1  ;;  %v3816_v60 = vand.u32 4294901760, %v3645_v13 }
  0x62   : > { %5209 = vst [vmem:[#allocation11_spill] sm:$0xff] %v3786_v12  ;;  %5210 = vst [vmem:[#allocation12_spill] sm:$0xff] %v3800_v55 }
  0x64   : > { %721 = vmatmul.mubr.f32.gmra.mrb[34].mxu1 %v720_v27  ;;  %1737 = vmatmul.mubr.f32.gmra.mrb[36].mxu0 %v729_v17  ;;  %v752_v27 = vsub.f32 %v3764_v3, %v751_v6  ;;  %v762_v17 = vand.u32 4294901760, %v3775_v18  ;;  %v3805_v3 = vand.u32 4294901760, %v3639_v9 }
  0x65   : > { %726 = vmatprep.mubr.f32.mxu1 %v3412_v1  ;;  %1742 = vmatprep.mubr.f32.mxu0 %v3412_v1 }
  0x66   : > { %v753_v54 = vand.u32 4294901760, %v752_v27  ;;  %v784_v27 = vand.u32 4294901760, %v3800_v55 }
  0x68   : > { %732 = vmatmul.mubr.f32.gmra.mrb[36].mxu1 %v731_v44  ;;  %1746 = vmatmul.mubr.f32.gmra.mrb[38].mxu0 %v740_v26  ;;  %v763_v26 = vsub.f32 %v3775_v18, %v762_v17  ;;  %v773_v44 = vand.u32 4294901760, %v3786_v12  ;;  %v3811_v18 = vsub.f32 %v3630_v61, %v3794_v25  ;;  %v3828_v61 = vsub.f32 %v3645_v13, %v3816_v60 }
  0x69   : > { %737 = vmatprep.mubr.f32.mxu1 %v3412_v1  ;;  %1751 = vmatprep.mubr.f32.mxu0 %v3412_v1 }
  0x6a   : > { %5211 = vst [vmem:[#allocation13_spill] sm:$0xff] %v3811_v18  ;;  %5213 = vst [vmem:[#allocation15_spill] sm:$0xff] %v3828_v61 }
  0x6c   : > { %743 = vmatmul.mubr.f32.gmra.mrb[38].mxu1 %v742_v2  ;;  %1755 = vmatmul.mubr.f32.gmra.mrb[40].mxu0 %v751_v6  ;;  %v764_v2 = vand.u32 4294901760, %v763_v26  ;;  %v774_v6 = vsub.f32 %v3786_v12, %v773_v44  ;;  %v795_v26 = vand.u32 4294901760, %v3811_v18  ;;  %v3822_v12 = vsub.f32 %v3639_v9, %v3805_v3 }
  0x6d   : > { %748 = vmatprep.mubr.f32.mxu1 %v3412_v1  ;;  %1760 = vmatprep.mubr.f32.mxu0 %v3412_v1  ;;  %v3838_v9 = vand.u32 4294901760, %v3659_v39 }
  0x6e   : > { %5212 = vst [vmem:[#allocation14_spill] sm:$0xff] %v3822_v12 }
  0x70   : > { %754 = vmatmul.mubr.f32.gmra.mrb[40].mxu1 %v753_v54  ;;  %1764 = vmatmul.mubr.f32.gmra.mrb[42].mxu0 %v762_v17  ;;  %v775_v54 = vand.u32 4294901760, %v774_v6  ;;  %v785_v17 = vsub.f32 %v3800_v55, %v784_v27  ;;  %v806_v6 = vand.u32 4294901760, %v3822_v12  ;;  %v3833_v55 = vand.u32 4294901760, %v3656_v36 }
  0x71   : > { %759 = vmatprep.mubr.f32.mxu1 %v3412_v1  ;;  %1769 = vmatprep.mubr.f32.mxu0 %v3412_v1 }
  0x74   : > { %765 = vmatmul.mubr.f32.gmra.mrb[42].mxu1 %v764_v2  ;;  %1773 = vmatmul.mubr.f32.gmra.mrb[44].mxu0 %v773_v44  ;;  %v786_v44 = vand.u32 4294901760, %v785_v17  ;;  %v796_v2 = vsub.f32 %v3811_v18, %v795_v26  ;;  %v3844_v17 = vsub.f32 %v3656_v36, %v3833_v55  ;;  %v3850_v18 = vsub.f32 %v3659_v39, %v3838_v9 }
  0x75   : > { %770 = vmatprep.mubr.f32.mxu1 %v3412_v1  ;;  %1778 = vmatprep.mubr.f32.mxu0 %v3412_v1 }
  0x76   : > { %v797_v13 = vand.u32 4294901760, %v796_v2  ;;  %5214 = vst [vmem:[#allocation16_spill] sm:$0xff] %v3844_v17  ;;  %5215 = vst [vmem:[#allocation17_spill] sm:$0xff] %v3850_v18  ;;  %v828_v2 = vand.u32 4294901760, %v3844_v17  ;;  %v839_v36 = vand.u32 4294901760, %v3850_v18 }
  0x78   : > { %776 = vmatmul.mubr.f32.gmra.mrb[44].mxu1 %v775_v54  ;;  %1782 = vmatmul.mubr.f32.gmra.mrb[46].mxu0 %v784_v27  ;;  %v807_v27 = vsub.f32 %v3822_v12, %v806_v6  ;;  %v817_v54 = vand.u32 4294901760, %v3828_v61  ;;  %v3855_v12 = vand.u32 4294901760, %v3666_v47 }
  0x79   : > { %781 = vmatprep.mubr.f32.mxu1 %v3412_v1  ;;  %1787 = vmatprep.mubr.f32.mxu0 %v3412_v1 }
  0x7c   : > { %787 = vmatmul.mubr.f32.gmra.mrb[46].mxu1 %v786_v44  ;;  %1791 = vmatmul.mubr.f32.gmra.mrb[48].mxu0 %v795_v26  ;;  %v808_v26 = vand.u32 4294901760, %v807_v27  ;;  %v818_v44 = vsub.f32 %v3828_v61, %v817_v54  ;;  %v3866_v27 = vand.u32 4294901760, %v3681_v5  ;;  %v840_v61 = vsub.f32 %v3850_v18, %v839_v36 }
  0x7d   : > { %792 = vmatprep.mubr.f32.mxu1 %v3412_v1  ;;  %1796 = vmatprep.mubr.f32.mxu0 %v3412_v1 }
  0x7e   : > { %v819_v39 = vand.u32 4294901760, %v818_v44  ;;  %v3874_v44 = vsub.f32 %v3681_v5, %v3866_v27 }
  0x80   : > { %798 = vmatmul.mubr.f32.gmra.mrb[48].mxu1 %v797_v13  ;;  %1800 = vmatmul.mubr.f32.gmra.mrb[50].mxu0 %v806_v6  ;;  %v829_v13 = vsub.f32 %v3844_v17, %v828_v2  ;;  %v3863_v6 = vsub.f32 %v3666_v47, %v3855_v12  ;;  %v3877_v47 = vand.u32 4294901760, %v3686_v10  ;;  %v841_v17 = vand.u32 4294901760, %v840_v61 }
  0x81   : > { %803 = vmatprep.mubr.f32.mxu1 %v3412_v1  ;;  %1805 = vmatprep.mubr.f32.mxu0 %v3412_v1 }
  0x84   : > { %809 = vmatmul.mubr.f32.gmra.mrb[50].mxu1 %v808_v26  ;;  %1809 = vmatmul.mubr.f32.gmra.mrb[52].mxu0 %v817_v54  ;;  %v830_v26 = vand.u32 4294901760, %v829_v13  ;;  %v850_v54 = vand.u32 4294901760, %v3863_v6  ;;  %v3885_v13 = vsub.f32 %v3686_v10, %v3877_v47 }
  0x85   : > { %814 = vmatprep.mubr.f32.mxu1 %v3412_v1  ;;  %1814 = vmatprep.mubr.f32.mxu0 %v3412_v1 }
  0x88   : > { %820 = vmatmul.mubr.f32.gmra.mrb[52].mxu1 %v819_v39  ;;  %1818 = vmatmul.mubr.f32.gmra.mrb[54].mxu0 %v828_v2  ;;  %v851_v39 = vsub.f32 %v3863_v6, %v850_v54  ;;  %v861_v2 = vand.u32 4294901760, %v3874_v44 }
  0x89   : > { %825 = vmatprep.mubr.f32.mxu1 %v3412_v1  ;;  %1823 = vmatprep.mubr.f32.mxu0 %v3412_v1 }
  0x8a   : > { %v852_v5 = vand.u32 4294901760, %v851_v39  ;;  %v862_v18 = vsub.f32 %v3874_v44, %v861_v2 }
  0x8c   : > { %831 = vmatmul.mubr.f32.gmra.mrb[54].mxu1 %v830_v26  ;;  %1827 = vmatmul.mubr.f32.gmra.mrb[56].mxu0 %v839_v36  ;;  %v872_v36 = vand.u32 4294901760, %v3885_v13  ;;  %v863_v61 = vand.u32 4294901760, %v862_v18 }
  0x8d   : > { %836 = vmatprep.mubr.f32.mxu1 %v3412_v1  ;;  %1832 = vmatprep.mubr.f32.mxu0 %v3412_v1 }
  0x8e   : > { %v873_v10 = vsub.f32 %v3885_v13, %v872_v36 }
  0x90   : > { %842 = vmatmul.mubr.f32.gmra.mrb[56].mxu1 %v841_v17  ;;  %1836 = vmatmul.mubr.f32.gmra.mrb[58].mxu0 %v850_v54  ;;  %v874_v17 = vand.u32 4294901760, %v873_v10 }
  0x91   : > { %847 = vmatprep.mubr.f32.mxu1 %v3412_v1  ;;  %1841 = vmatprep.mubr.f32.mxu0 %v3412_v1 }
  0x94   : > { %853 = vmatmul.mubr.f32.gmra.mrb[58].mxu1 %v852_v5  ;;  %1845 = vmatmul.mubr.f32.gmra.mrb[60].mxu0 %v861_v2 }
  0x95   : > { %858 = vmatprep.mubr.f32.mxu1 %v3412_v1  ;;  %1850 = vmatprep.mubr.f32.mxu0 %v3412_v1 }
  0x98   : > { %864 = vmatmul.mubr.f32.gmra.mrb[60].mxu1 %v863_v61  ;;  %1854 = vmatmul.mubr.f32.gmra.mrb[62].mxu0 %v872_v36 }
  0x99   : > { %869 = vmatprep.mubr.f32.mxu1 %v3412_v1  ;;  %1930 = vmatprep.mubr.f32.mxu0 %v3412_v1 }
  0x9c   : > { %875 = vmatmul.mubr.f32.gmra.mrb[62].mxu1 %v874_v17  ;;  %1932 = vmatmul.mubr.f32.vlgmr.msra.gmra.mrb[0].mxu0 %v3481_v14 }
  0x9d   : > { %955 = vmatprep.mubr.f32.mxu1 %v3412_v1  ;;  %1937 = vmatprep.mubr.f32.mxu0 %v3412_v1 }
  0x9e   : > { %2158 = vmatpush1.msra.mxu0 %v3472_v8  ;;  %v5216_v8 = vld [vmem:[#allocation5_spill] sm:$0xff] }
  0xa0   : > { %957 = vmatmul.mubr.f32.vlgmr.msra.gmra.mrb[0].mxu1 %v3481_v14  ;;  %1939 = vmatmul.mubr.f32.gmra.mrb[2].mxu0 %v3490_v21 }
  0xa1   : > { %1185 = vmatpush1.msra.mxu1 %v3488_v19  ;;  %962 = vmatprep.mubr.f32.mxu1 %v3412_v1  ;;  %v5218_v19 = vld [vmem:[#allocation7_spill] sm:$0xff] }
  0xa2   : > { %1944 = vmatprep.mubr.f32.mxu0 %v3412_v1 }
  0xa4   : > { %964 = vmatmul.mubr.f32.gmra.mrb[2].mxu1 %v3490_v21  ;;  %1946 = vmatmul.mubr.f32.gmra.mrb[4].mxu0 %v3492_v22 }
  0xa5   : > { %969 = vmatprep.mubr.f32.mxu1 %v3412_v1  ;;  %1951 = vmatprep.mubr.f32.mxu0 %v3412_v1 }
  0xa8   : > { %971 = vmatmul.mubr.f32.gmra.mrb[4].mxu1 %v3492_v22  ;;  %1953 = vmatmul.mubr.f32.gmra.mrb[6].mxu0 %v3499_v24 }
  0xa9   : > { %976 = vmatprep.mubr.f32.mxu1 %v3412_v1  ;;  %1958 = vmatprep.mubr.f32.mxu0 %v3412_v1 }
  0xac   : > { %978 = vmatmul.mubr.f32.gmra.mrb[6].mxu1 %v3499_v24  ;;  %1960 = vmatmul.mubr.f32.gmra.mrb[8].mxu0 %v3513_v35 }
  0xad   : > { %983 = vmatprep.mubr.f32.mxu1 %v3412_v1  ;;  %1965 = vmatprep.mubr.f32.mxu0 %v3412_v1 }
  0xb0   : > { %985 = vmatmul.mubr.f32.gmra.mrb[8].mxu1 %v3513_v35  ;;  %1967 = vmatmul.mubr.f32.gmra.mrb[10].mxu0 %v3527_v46 }
  0xb1   : > { %990 = vmatprep.mubr.f32.mxu1 %v3412_v1  ;;  %1972 = vmatprep.mubr.f32.mxu0 %v3412_v1 }
  0xb4   : > { %992 = vmatmul.mubr.f32.gmra.mrb[10].mxu1 %v3527_v46  ;;  %1974 = vmatmul.mubr.f32.gmra.mrb[12].mxu0 %v3540_v56 }
  0xb5   : > { %997 = vmatprep.mubr.f32.mxu1 %v3412_v1  ;;  %1979 = vmatprep.mubr.f32.mxu0 %v3412_v1 }
  0xb8   : > { %999 = vmatmul.mubr.f32.gmra.mrb[12].mxu1 %v3540_v56  ;;  %1981 = vmatmul.mubr.f32.gmra.mrb[14].mxu0 %v3551_v63 }
  0xb9   : > { %1004 = vmatprep.mubr.f32.mxu1 %v3412_v1  ;;  %1986 = vmatprep.mubr.f32.mxu0 %v3412_v1 }
  0xbc   : > { %1006 = vmatmul.mubr.f32.gmra.mrb[14].mxu1 %v3551_v63  ;;  %1988 = vmatmul.mubr.f32.gmra.mrb[16].mxu0 %v3567_v16 }
  0xbd   : > { %1011 = vmatprep.mubr.f32.mxu1 %v3412_v1  ;;  %1993 = vmatprep.mubr.f32.mxu0 %v3412_v1 }
  0xc0   : > { %1013 = vmatmul.mubr.f32.gmra.mrb[16].mxu1 %v3567_v16  ;;  %1995 = vmatmul.mubr.f32.gmra.mrb[18].mxu0 %v3585_v31 }
  0xc1   : > { %1018 = vmatprep.mubr.f32.mxu1 %v3412_v1  ;;  %2000 = vmatprep.mubr.f32.mxu0 %v3412_v1 }
  0xc4   : > { %1020 = vmatmul.mubr.f32.gmra.mrb[18].mxu1 %v3585_v31  ;;  %2002 = vmatmul.mubr.f32.gmra.mrb[20].mxu0 %v3604_v43 }
  0xc5   : > { %1025 = vmatprep.mubr.f32.mxu1 %v3412_v1  ;;  %2007 = vmatprep.mubr.f32.mxu0 %v3412_v1 }
  0xc8   : > { %1027 = vmatmul.mubr.f32.gmra.mrb[20].mxu1 %v3604_v43  ;;  %2009 = vmatmul.mubr.f32.gmra.mrb[22].mxu0 %v3624_v59 }
  0xc9   : > { %1032 = vmatprep.mubr.f32.mxu1 %v3412_v1  ;;  %2014 = vmatprep.mubr.f32.mxu0 %v3412_v1 }
  0xcc   : > { %1034 = vmatmul.mubr.f32.gmra.mrb[22].mxu1 %v3624_v59  ;;  %2016 = vmatmul.mubr.f32.gmra.mrb[24].mxu0 %v3651_v30 }
  0xcd   : > { %1039 = vmatprep.mubr.f32.mxu1 %v3412_v1  ;;  %2021 = vmatprep.mubr.f32.mxu0 %v3412_v1 }
  0xd0   : > { %1041 = vmatmul.mubr.f32.gmra.mrb[24].mxu1 %v3651_v30  ;;  %2023 = vmatmul.mubr.f32.gmra.mrb[26].mxu0 %v3674_v57 }
  0xd1   : > { %1046 = vmatprep.mubr.f32.mxu1 %v3412_v1  ;;  %2028 = vmatprep.mubr.f32.mxu0 %v3412_v1 }
  0xd4   : > { %1048 = vmatmul.mubr.f32.gmra.mrb[26].mxu1 %v3674_v57  ;;  %2030 = vmatmul.mubr.f32.gmra.mrb[28].mxu0 %v3692_v33 }
  0xd5   : > { %1053 = vmatprep.mubr.f32.mxu1 %v3412_v1  ;;  %2035 = vmatprep.mubr.f32.mxu0 %v3412_v1 }
  0xd8   : > { %1055 = vmatmul.mubr.f32.gmra.mrb[28].mxu1 %v3692_v33  ;;  %2037 = vmatmul.mubr.f32.gmra.mrb[30].mxu0 %v3702_v42 }
  0xd9   : > { %1060 = vmatprep.mubr.f32.mxu1 %v3412_v1  ;;  %2042 = vmatprep.mubr.f32.mxu0 %v3412_v1 }
  0xdc   : > { %1062 = vmatmul.mubr.f32.gmra.mrb[30].mxu1 %v3702_v42  ;;  %2044 = vmatmul.mubr.f32.gmra.mrb[32].mxu0 %v3707_v52 }
  0xdd   : > { %1067 = vmatprep.mubr.f32.mxu1 %v3412_v1  ;;  %2049 = vmatprep.mubr.f32.mxu0 %v3412_v1 }
  0xe0   : > { %1069 = vmatmul.mubr.f32.gmra.mrb[32].mxu1 %v3707_v52  ;;  %2051 = vmatmul.mubr.f32.gmra.mrb[34].mxu0 %v3723_v48 }
  0xe1   : > { %1074 = vmatprep.mubr.f32.mxu1 %v3412_v1  ;;  %2056 = vmatprep.mubr.f32.mxu0 %v3412_v1 }
  0xe4   : > { %1076 = vmatmul.mubr.f32.gmra.mrb[34].mxu1 %v3723_v48  ;;  %2058 = vmatmul.mubr.f32.gmra.mrb[36].mxu0 %v3728_v34 }
  0xe5   : > { %1081 = vmatprep.mubr.f32.mxu1 %v3412_v1  ;;  %2063 = vmatprep.mubr.f32.mxu0 %v3412_v1 }
  0xe8   : > { %1083 = vmatmul.mubr.f32.gmra.mrb[36].mxu1 %v3728_v34  ;;  %2065 = vmatmul.mubr.f32.gmra.mrb[38].mxu0 %v3739_v0 }
  0xe9   : > { %1088 = vmatprep.mubr.f32.mxu1 %v3412_v1  ;;  %2070 = vmatprep.mubr.f32.mxu0 %v3412_v1 }
  0xec   : > { %1090 = vmatmul.mubr.f32.gmra.mrb[38].mxu1 %v3739_v0  ;;  %2072 = vmatmul.mubr.f32.gmra.mrb[40].mxu0 %v3756_v4 }
  0xed   : > { %1095 = vmatprep.mubr.f32.mxu1 %v3412_v1  ;;  %2077 = vmatprep.mubr.f32.mxu0 %v3412_v1 }
  0xf0   : > { %1097 = vmatmul.mubr.f32.gmra.mrb[40].mxu1 %v3756_v4  ;;  %2079 = vmatmul.mubr.f32.gmra.mrb[42].mxu0 %v3767_v7 }
  0xf1   : > { %1102 = vmatprep.mubr.f32.mxu1 %v3412_v1  ;;  %2084 = vmatprep.mubr.f32.mxu0 %v3412_v1 }
  0xf4   : > { %1104 = vmatmul.mubr.f32.gmra.mrb[42].mxu1 %v3767_v7  ;;  %2086 = vmatmul.mubr.f32.gmra.mrb[44].mxu0 %v3778_v40 }
  0xf5   : > { %1109 = vmatprep.mubr.f32.mxu1 %v3412_v1  ;;  %2091 = vmatprep.mubr.f32.mxu0 %v3412_v1 }
  0xf8   : > { %1111 = vmatmul.mubr.f32.gmra.mrb[44].mxu1 %v3778_v40  ;;  %2093 = vmatmul.mubr.f32.gmra.mrb[46].mxu0 %v3789_v41 }
  0xf9   : > { %1116 = vmatprep.mubr.f32.mxu1 %v3412_v1  ;;  %2098 = vmatprep.mubr.f32.mxu0 %v3412_v1 }
  0xfc   : > { %1118 = vmatmul.mubr.f32.gmra.mrb[46].mxu1 %v3789_v41  ;;  %2100 = vmatmul.mubr.f32.gmra.mrb[48].mxu0 %v3794_v25 }
  0xfd   : > { %1123 = vmatprep.mubr.f32.mxu1 %v3412_v1  ;;  %2105 = vmatprep.mubr.f32.mxu0 %v3412_v1 }
 0x100   : > { %1125 = vmatmul.mubr.f32.gmra.mrb[48].mxu1 %v3794_v25  ;;  %2107 = vmatmul.mubr.f32.gmra.mrb[50].mxu0 %v3805_v3 }
 0x101   : > { %1130 = vmatprep.mubr.f32.mxu1 %v3412_v1  ;;  %2112 = vmatprep.mubr.f32.mxu0 %v3412_v1 }
 0x104   : > { %1132 = vmatmul.mubr.f32.gmra.mrb[50].mxu1 %v3805_v3  ;;  %2114 = vmatmul.mubr.f32.gmra.mrb[52].mxu0 %v3816_v60 }
 0x105   : > { %1137 = vmatprep.mubr.f32.mxu1 %v3412_v1  ;;  %2119 = vmatprep.mubr.f32.mxu0 %v3412_v1 }
 0x108   : > { %1139 = vmatmul.mubr.f32.gmra.mrb[52].mxu1 %v3816_v60  ;;  %2121 = vmatmul.mubr.f32.gmra.mrb[54].mxu0 %v3833_v55 }
 0x109   : > { %1144 = vmatprep.mubr.f32.mxu1 %v3412_v1  ;;  %2126 = vmatprep.mubr.f32.mxu0 %v3412_v1 }
 0x10c   : > { %1146 = vmatmul.mubr.f32.gmra.mrb[54].mxu1 %v3833_v55  ;;  %2128 = vmatmul.mubr.f32.gmra.mrb[56].mxu0 %v3838_v9 }
 0x10d   : > { %1151 = vmatprep.mubr.f32.mxu1 %v3412_v1  ;;  %2133 = vmatprep.mubr.f32.mxu0 %v3412_v1 }
 0x110   : > { %1153 = vmatmul.mubr.f32.gmra.mrb[56].mxu1 %v3838_v9  ;;  %2135 = vmatmul.mubr.f32.gmra.mrb[58].mxu0 %v3855_v12 }
 0x111   : > { %1158 = vmatprep.mubr.f32.mxu1 %v3412_v1  ;;  %2140 = vmatprep.mubr.f32.mxu0 %v3412_v1 }
 0x114   : > { %1160 = vmatmul.mubr.f32.gmra.mrb[58].mxu1 %v3855_v12  ;;  %2142 = vmatmul.mubr.f32.gmra.mrb[60].mxu0 %v3866_v27 }
 0x115   : > { %1165 = vmatprep.mubr.f32.mxu1 %v3412_v1  ;;  %2147 = vmatprep.mubr.f32.mxu0 %v3412_v1 }
 0x118   : > { %1167 = vmatmul.mubr.f32.gmra.mrb[60].mxu1 %v3866_v27  ;;  %2149 = vmatmul.mubr.f32.gmra.mrb[62].mxu0 %v3877_v47 }
 0x119   : > { %1172 = vmatprep.mubr.f32.mxu1 %v3412_v1  ;;  %2221 = vmatprep.mubr.f32.mxu0 %v3412_v1 }
 0x11c   : > { %1174 = vmatmul.mubr.f32.gmra.mrb[62].mxu1 %v3877_v47  ;;  %2223 = vmatmul.mubr.f32.vlgmr.msra.gmra.mrb[0].mxu0 %v3481_v14  ;;  %v5217_v14 = vld [vmem:[#allocation6_spill] sm:$0xff] }
 0x11d   : > { %1248 = vmatprep.mubr.f32.mxu1 %v3412_v1  ;;  %2228 = vmatprep.mubr.f32.mxu0 %v3412_v1 }
 0x120   : > { %1251 = vmatmul.mubr.f32.vlgmr.msra.gmra.mrb[0].mxu1 %v3496_v23  ;;  %2230 = vmatmul.mubr.f32.gmra.mrb[2].mxu0 %v3490_v21  ;;  %v5219_v21 = vld [vmem:[#allocation8_spill] sm:$0xff]  ;;  %v5222_v23 = vld [vmem:[#allocation11_spill] sm:$0xff] }
 0x121   : > { %1256 = vmatprep.mubr.f32.mxu1 %v3412_v1  ;;  %2235 = vmatprep.mubr.f32.mxu0 %v3412_v1 }
 0x124   : > { %1259 = vmatmul.mubr.f32.gmra.mrb[2].mxu1 %v3504_v28  ;;  %2237 = vmatmul.mubr.f32.gmra.mrb[4].mxu0 %v3492_v22  ;;  %v5220_v22 = vld [vmem:[#allocation9_spill] sm:$0xff] }
 0x125   : > { %1264 = vmatprep.mubr.f32.mxu1 %v3412_v1  ;;  %2242 = vmatprep.mubr.f32.mxu0 %v3412_v1  ;;  %v5224_v28 = vld [vmem:[#allocation13_spill] sm:$0xff] }
 0x128   : > { %1267 = vmatmul.mubr.f32.gmra.mrb[4].mxu1 %v3507_v29  ;;  %2244 = vmatmul.mubr.f32.gmra.mrb[6].mxu0 %v3499_v24  ;;  %v5223_v24 = vld [vmem:[#allocation12_spill] sm:$0xff]  ;;  %v5225_v29 = vld [vmem:[#allocation14_spill] sm:$0xff] }
 0x129   : > { %1272 = vmatprep.mubr.f32.mxu1 %v3412_v1  ;;  %2249 = vmatprep.mubr.f32.mxu0 %v3412_v1 }
 0x12c   : > { %1275 = vmatmul.mubr.f32.gmra.mrb[6].mxu1 %v3518_v38  ;;  %2251 = vmatmul.mubr.f32.gmra.mrb[8].mxu0 %v3513_v35  ;;  %v5226_v35 = vld [vmem:[#allocation15_spill] sm:$0xff]  ;;  %v5227_v38 = vld [vmem:[#allocation16_spill] sm:$0xff] }
 0x12d   : > { %1280 = vmatprep.mubr.f32.mxu1 %v3412_v1  ;;  %2256 = vmatprep.mubr.f32.mxu0 %v3412_v1 }
 0x130   : > { %1283 = vmatmul.mubr.f32.gmra.mrb[8].mxu1 %v3525_v45  ;;  %2258 = vmatmul.mubr.f32.gmra.mrb[10].mxu0 %v3527_v46  ;;  %v5228_v45 = vld [vmem:[#allocation17_spill] sm:$0xff] }
 0x131   : > { %1288 = vmatprep.mubr.f32.mxu1 %v3412_v1  ;;  %2263 = vmatprep.mubr.f32.mxu0 %v3412_v1 }
 0x134   : > { %1291 = vmatmul.mubr.f32.gmra.mrb[10].mxu1 %v3537_v53  ;;  %2265 = vmatmul.mubr.f32.gmra.mrb[12].mxu0 %v3540_v56 }
 0x135   : > { %1296 = vmatprep.mubr.f32.mxu1 %v3412_v1  ;;  %2270 = vmatprep.mubr.f32.mxu0 %v3412_v1 }
 0x138   : > { %1299 = vmatmul.mubr.f32.gmra.mrb[12].mxu1 %v3549_v62  ;;  %2272 = vmatmul.mubr.f32.gmra.mrb[14].mxu0 %v3551_v63 }
 0x139   : > { %1304 = vmatprep.mubr.f32.mxu1 %v3412_v1  ;;  %2277 = vmatprep.mubr.f32.mxu0 %v3412_v1 }
 0x13c   : > { %1307 = vmatmul.mubr.f32.gmra.mrb[14].mxu1 %v3565_v15  ;;  %2279 = vmatmul.mubr.f32.gmra.mrb[16].mxu0 %v3567_v16 }
 0x13d   : > { %1312 = vmatprep.mubr.f32.mxu1 %v3412_v1  ;;  %2284 = vmatprep.mubr.f32.mxu0 %v3412_v1 }
 0x140   : > { %1315 = vmatmul.mubr.f32.gmra.mrb[16].mxu1 %v3592_v37  ;;  %2286 = vmatmul.mubr.f32.gmra.mrb[18].mxu0 %v3585_v31 }
 0x141   : > { %1320 = vmatprep.mubr.f32.mxu1 %v3412_v1  ;;  %2291 = vmatprep.mubr.f32.mxu0 %v3412_v1 }
 0x144   : > { %1323 = vmatmul.mubr.f32.gmra.mrb[18].mxu1 %v3610_v50  ;;  %2293 = vmatmul.mubr.f32.gmra.mrb[20].mxu0 %v3604_v43 }
 0x145   : > { %1328 = vmatprep.mubr.f32.mxu1 %v3412_v1  ;;  %2298 = vmatprep.mubr.f32.mxu0 %v3412_v1 }
 0x148   : > { %1331 = vmatmul.mubr.f32.gmra.mrb[20].mxu1 %v3622_v58  ;;  %2300 = vmatmul.mubr.f32.gmra.mrb[22].mxu0 %v3624_v59 }
 0x149   : > { %1336 = vmatprep.mubr.f32.mxu1 %v3412_v1  ;;  %2305 = vmatprep.mubr.f32.mxu0 %v3412_v1 }
 0x14c   : > { %1339 = vmatmul.mubr.f32.gmra.mrb[22].mxu1 %v3649_v20  ;;  %2307 = vmatmul.mubr.f32.gmra.mrb[24].mxu0 %v3651_v30 }
 0x14d   : > { %1344 = vmatprep.mubr.f32.mxu1 %v3412_v1  ;;  %2312 = vmatprep.mubr.f32.mxu0 %v3412_v1 }
 0x150   : > { %1347 = vmatmul.mubr.f32.gmra.mrb[24].mxu1 %v3670_v49  ;;  %2314 = vmatmul.mubr.f32.gmra.mrb[26].mxu0 %v3674_v57 }
 0x151   : > { %1352 = vmatprep.mubr.f32.mxu1 %v3412_v1  ;;  %2319 = vmatprep.mubr.f32.mxu0 %v3412_v1 }
 0x154   : > { %1355 = vmatmul.mubr.f32.gmra.mrb[26].mxu1 %v3690_v32  ;;  %2321 = vmatmul.mubr.f32.gmra.mrb[28].mxu0 %v3692_v33 }
 0x155   : > { %1360 = vmatprep.mubr.f32.mxu1 %v3412_v1  ;;  %2326 = vmatprep.mubr.f32.mxu0 %v3412_v1 }
 0x158   : > { %1363 = vmatmul.mubr.f32.gmra.mrb[28].mxu1 %v3700_v51  ;;  %2328 = vmatmul.mubr.f32.gmra.mrb[30].mxu0 %v3702_v42 }
 0x159   : > { %1368 = vmatprep.mubr.f32.mxu1 %v3412_v1  ;;  %2333 = vmatprep.mubr.f32.mxu0 %v3412_v1 }
 0x15c   : > { %1371 = vmatmul.mubr.f32.gmra.mrb[30].mxu1 %v3712_v11  ;;  %2335 = vmatmul.mubr.f32.gmra.mrb[32].mxu0 %v3707_v52 }
 0x15d   : > { %1376 = vmatprep.mubr.f32.mxu1 %v3412_v1  ;;  %2340 = vmatprep.mubr.f32.mxu0 %v3412_v1 }
 0x160   : > { %1379 = vmatmul.mubr.f32.gmra.mrb[32].mxu1 %v5216_v8  ;;  %2342 = vmatmul.mubr.f32.gmra.mrb[34].mxu0 %v3723_v48 }
 0x161   : > { %1384 = vmatprep.mubr.f32.mxu1 %v3412_v1  ;;  %2347 = vmatprep.mubr.f32.mxu0 %v3412_v1 }
 0x164   : > { %1387 = vmatmul.mubr.f32.gmra.mrb[34].mxu1 %v5217_v14  ;;  %2349 = vmatmul.mubr.f32.gmra.mrb[36].mxu0 %v3728_v34 }
 0x165   : > { %1392 = vmatprep.mubr.f32.mxu1 %v3412_v1  ;;  %2354 = vmatprep.mubr.f32.mxu0 %v3412_v1 }
 0x168   : > { %1395 = vmatmul.mubr.f32.gmra.mrb[36].mxu1 %v5218_v19  ;;  %2356 = vmatmul.mubr.f32.gmra.mrb[38].mxu0 %v3739_v0  ;;  %v5221_v0 = vld [vmem:[#allocation10_spill] sm:$0xff] }
 0x169   : > { %1400 = vmatprep.mubr.f32.mxu1 %v3412_v1  ;;  %2361 = vmatprep.mubr.f32.mxu0 %v3412_v1 }
 0x16c   : > { %1403 = vmatmul.mubr.f32.gmra.mrb[38].mxu1 %v5219_v21  ;;  %2363 = vmatmul.mubr.f32.gmra.mrb[40].mxu0 %v3756_v4 }
 0x16d   : > { %1408 = vmatprep.mubr.f32.mxu1 %v3412_v1  ;;  %2368 = vmatprep.mubr.f32.mxu0 %v3412_v1 }
 0x170   : > { %1411 = vmatmul.mubr.f32.gmra.mrb[40].mxu1 %v5220_v22  ;;  %2370 = vmatmul.mubr.f32.gmra.mrb[42].mxu0 %v3767_v7 }
 0x171   : > { %1416 = vmatprep.mubr.f32.mxu1 %v3412_v1  ;;  %2375 = vmatprep.mubr.f32.mxu0 %v3412_v1 }
 0x174   : > { %1419 = vmatmul.mubr.f32.gmra.mrb[42].mxu1 %v5221_v0  ;;  %2377 = vmatmul.mubr.f32.gmra.mrb[44].mxu0 %v3778_v40 }
 0x175   : > { %1424 = vmatprep.mubr.f32.mxu1 %v3412_v1  ;;  %2382 = vmatprep.mubr.f32.mxu0 %v3412_v1 }
 0x178   : > { %1427 = vmatmul.mubr.f32.gmra.mrb[44].mxu1 %v5222_v23  ;;  %2384 = vmatmul.mubr.f32.gmra.mrb[46].mxu0 %v3789_v41 }
 0x179   : > { %1432 = vmatprep.mubr.f32.mxu1 %v3412_v1  ;;  %2389 = vmatprep.mubr.f32.mxu0 %v3412_v1 }
 0x17c   : > { %1435 = vmatmul.mubr.f32.gmra.mrb[46].mxu1 %v5223_v24  ;;  %2391 = vmatmul.mubr.f32.gmra.mrb[48].mxu0 %v3794_v25 }
 0x17d   : > { %1440 = vmatprep.mubr.f32.mxu1 %v3412_v1  ;;  %2396 = vmatprep.mubr.f32.mxu0 %v3412_v1 }
 0x180   : > { %1443 = vmatmul.mubr.f32.gmra.mrb[48].mxu1 %v5224_v28  ;;  %2398 = vmatmul.mubr.f32.gmra.mrb[50].mxu0 %v3805_v3 }
 0x181   : > { %1448 = vmatprep.mubr.f32.mxu1 %v3412_v1  ;;  %2403 = vmatprep.mubr.f32.mxu0 %v3412_v1 }
 0x184   : > { %1451 = vmatmul.mubr.f32.gmra.mrb[50].mxu1 %v5225_v29  ;;  %2405 = vmatmul.mubr.f32.gmra.mrb[52].mxu0 %v3816_v60 }
 0x185   : > { %1456 = vmatprep.mubr.f32.mxu1 %v3412_v1  ;;  %2410 = vmatprep.mubr.f32.mxu0 %v3412_v1 }
 0x188   : > { %1459 = vmatmul.mubr.f32.gmra.mrb[52].mxu1 %v5226_v35  ;;  %2412 = vmatmul.mubr.f32.gmra.mrb[54].mxu0 %v3833_v55 }
 0x189   : > { %1464 = vmatprep.mubr.f32.mxu1 %v3412_v1  ;;  %2417 = vmatprep.mubr.f32.mxu0 %v3412_v1 }
 0x18c   : > { %1467 = vmatmul.mubr.f32.gmra.mrb[54].mxu1 %v5227_v38  ;;  %2419 = vmatmul.mubr.f32.gmra.mrb[56].mxu0 %v3838_v9 }
 0x18d   : > { %1472 = vmatprep.mubr.f32.mxu1 %v3412_v1  ;;  %2424 = vmatprep.mubr.f32.mxu0 %v3412_v1 }
 0x190   : > { %1475 = vmatmul.mubr.f32.gmra.mrb[56].mxu1 %v5228_v45  ;;  %2426 = vmatmul.mubr.f32.gmra.mrb[58].mxu0 %v3855_v12 }
 0x191   : > { %1480 = vmatprep.mubr.f32.mxu1 %v3412_v1  ;;  %2431 = vmatprep.mubr.f32.mxu0 %v3412_v1 }
 0x194   : > { %1483 = vmatmul.mubr.f32.gmra.mrb[58].mxu1 %v3863_v6  ;;  %2433 = vmatmul.mubr.f32.gmra.mrb[60].mxu0 %v3866_v27 }
 0x195   : > { %1488 = vmatprep.mubr.f32.mxu1 %v3412_v1  ;;  %2438 = vmatprep.mubr.f32.mxu0 %v3412_v1 }
 0x198   : > { %1491 = vmatmul.mubr.f32.gmra.mrb[60].mxu1 %v3874_v44  ;;  %2440 = vmatmul.mubr.f32.gmra.mrb[62].mxu0 %v3877_v47 }
 0x199   : > { %1496 = vmatprep.mubr.f32.mxu1 %v3412_v1 }
 0x19c   : > { %1499 = vmatmul.mubr.f32.gmra.mrb[62].mxu1 %v3885_v13 }
 0x1ef   : > { %v2224_v46 = vpop.f32.mrb[0].mxu0 }
 0x1f0   : > { %v2226_v53 = vpop.f32.mrb[1].mxu0 }
 0x1f3   : > { %v1252_v56 = vpop.f32.mrb[0].mxu1  ;;  %v2231_v62 = vpop.f32.mrb[2].mxu0 }
 0x1f4   : > { %v4155_v63 = vadd.f32 %v2224_v46, %v1252_v56  ;;  %v1254_v15 = vpop.f32.mrb[1].mxu1  ;;  %v2233_v16 = vpop.f32.mrb[3].mxu0 }
 0x1f5   : > { %v4157_v31 = vadd.f32 %v2226_v53, %v1254_v15 }
 0x1f7   : > { %5229 = vst [vmem:[#allocation5_spill] sm:$0xff] %v4157_v31  ;;  %v1260_v37 = vpop.f32.mrb[2].mxu1  ;;  %v2238_v43 = vpop.f32.mrb[4].mxu0 }
 0x1f8   : > { %v4159_v50 = vadd.f32 %v2231_v62, %v1260_v37  ;;  %v1262_v58 = vpop.f32.mrb[3].mxu1  ;;  %v2240_v59 = vpop.f32.mrb[5].mxu0 }
 0x1f9   : > { %v4161_v20 = vadd.f32 %v2233_v16, %v1262_v58 }
 0x1fb   : > { %5230 = vst [vmem:[#allocation6_spill] sm:$0xff] %v4161_v20  ;;  %v1268_v1 = vpop.f32.mrb[4].mxu1  ;;  %v2245_v30 = vpop.f32.mrb[6].mxu0 }
 0x1fc   : > { %v4163_v49 = vadd.f32 %v2238_v43, %v1268_v1  ;;  %v1270_v57 = vpop.f32.mrb[5].mxu1  ;;  %v2247_v32 = vpop.f32.mrb[7].mxu0 }
 0x1fd   : > { %v4165_v33 = vadd.f32 %v2240_v59, %v1270_v57 }
 0x1fe   : > { %v2446_v51 = vmin.f32 %v4155_v63, %v4163_v49 }
 0x1ff   : > { %5231 = vst [vmem:[#allocation7_spill] sm:$0xff] %v4165_v33  ;;  %v2483_v42 = vmin.f32 %v4157_v31, %v4165_v33  ;;  %v1276_v52 = vpop.f32.mrb[6].mxu1  ;;  %v2252_v11 = vpop.f32.mrb[8].mxu0 }
 0x200   : > { %v4171_v4 = vadd.f32 %v2245_v30, %v1276_v52  ;;  %v1278_v48 = vpop.f32.mrb[7].mxu1  ;;  %v2254_v34 = vpop.f32.mrb[9].mxu0 }
 0x201   : > { %v4173_v25 = vadd.f32 %v2247_v32, %v1278_v48 }
 0x202   : > { %v2447_v3 = vmin.f32 %v4159_v50, %v4171_v4 }
 0x203   : > { %5232 = vst [vmem:[#allocation8_spill] sm:$0xff] %v4173_v25  ;;  %v2484_v7 = vmin.f32 %v4161_v20, %v4173_v25  ;;  %v1284_v18 = vpop.f32.mrb[8].mxu1  ;;  %v2259_v40 = vpop.f32.mrb[10].mxu0 }
 0x204   : > { %v4179_v12 = vadd.f32 %v2252_v11, %v1284_v18  ;;  %v1286_v41 = vpop.f32.mrb[9].mxu1  ;;  %v2261_v55 = vpop.f32.mrb[11].mxu0 }
 0x205   : > { %v4181_v60 = vadd.f32 %v2254_v34, %v1286_v41 }
 0x206   : > { %v2448_v9 = vmin.f32 %v2446_v51, %v4179_v12 }
 0x207   : > { %5233 = vst [vmem:[#allocation9_spill] sm:$0xff] %v4181_v60  ;;  %v2485_v6 = vmin.f32 %v2483_v42, %v4181_v60  ;;  %v1292_v27 = vpop.f32.mrb[10].mxu1  ;;  %v2266_v26 = vpop.f32.mrb[12].mxu0 }
 0x208   : > { %v4185_v54 = vadd.f32 %v2259_v40, %v1292_v27  ;;  %v1294_v44 = vpop.f32.mrb[11].mxu1  ;;  %v2268_v47 = vpop.f32.mrb[13].mxu0 }
 0x209   : > { %v4187_v39 = vadd.f32 %v2261_v55, %v1294_v44 }
 0x20a   : > { %v2449_v2 = vmin.f32 %v2447_v3, %v4185_v54 }
 0x20b   : > { %5234 = vst [vmem:[#allocation10_spill] sm:$0xff] %v4187_v39  ;;  %v2486_v13 = vmin.f32 %v2484_v7, %v4187_v39  ;;  %v1300_v5 = vpop.f32.mrb[12].mxu1  ;;  %v2273_v36 = vpop.f32.mrb[14].mxu0 }
 0x20c   : > { %v4191_v61 = vadd.f32 %v2266_v26, %v1300_v5  ;;  %v1302_v10 = vpop.f32.mrb[13].mxu1  ;;  %v2275_v17 = vpop.f32.mrb[15].mxu0 }
 0x20d   : > { %v4193_v8 = vadd.f32 %v2268_v47, %v1302_v10 }
 0x20e   : > { %v2450_v14 = vmin.f32 %v2448_v9, %v4191_v61 }
 0x20f   : > { %5235 = vst [vmem:[#allocation11_spill] sm:$0xff] %v4193_v8  ;;  %v2487_v19 = vmin.f32 %v2485_v6, %v4193_v8  ;;  %v1308_v21 = vpop.f32.mrb[14].mxu1  ;;  %v2280_v22 = vpop.f32.mrb[16].mxu0 }
 0x210   : > { %v4197_v0 = vadd.f32 %v2273_v36, %v1308_v21  ;;  %v1310_v23 = vpop.f32.mrb[15].mxu1  ;;  %v2282_v24 = vpop.f32.mrb[17].mxu0 }
 0x211   : > { %v4199_v28 = vadd.f32 %v2275_v17, %v1310_v23 }
 0x212   : > { %v2451_v29 = vmin.f32 %v2449_v2, %v4197_v0 }
 0x213   : > { %5236 = vst [vmem:[#allocation12_spill] sm:$0xff] %v4199_v28  ;;  %v2488_v35 = vmin.f32 %v2486_v13, %v4199_v28  ;;  %v1316_v38 = vpop.f32.mrb[16].mxu1  ;;  %v2287_v45 = vpop.f32.mrb[18].mxu0 }
 0x214   : > { %v4203_v46 = vadd.f32 %v2280_v22, %v1316_v38  ;;  %v1318_v53 = vpop.f32.mrb[17].mxu1  ;;  %v2289_v56 = vpop.f32.mrb[19].mxu0 }
 0x215   : > { %v4205_v62 = vadd.f32 %v2282_v24, %v1318_v53 }
 0x216   : > { %v2452_v15 = vmin.f32 %v2450_v14, %v4203_v46 }
 0x217   : > { %5237 = vst [vmem:[#allocation13_spill] sm:$0xff] %v4205_v62  ;;  %v2489_v16 = vmin.f32 %v2487_v19, %v4205_v62  ;;  %v1324_v37 = vpop.f32.mrb[18].mxu1  ;;  %v2294_v43 = vpop.f32.mrb[20].mxu0 }
 0x218   : > { %v4209_v58 = vadd.f32 %v2287_v45, %v1324_v37  ;;  %v1326_v59 = vpop.f32.mrb[19].mxu1  ;;  %v2296_v1 = vpop.f32.mrb[21].mxu0 }
 0x219   : > { %v4211_v30 = vadd.f32 %v2289_v56, %v1326_v59 }
 0x21a   : > { %v2453_v57 = vmin.f32 %v2451_v29, %v4209_v58 }
 0x21b   : > { %5238 = vst [vmem:[#allocation14_spill] sm:$0xff] %v4211_v30  ;;  %v2490_v32 = vmin.f32 %v2488_v35, %v4211_v30  ;;  %v1332_v51 = vpop.f32.mrb[20].mxu1  ;;  %v2301_v42 = vpop.f32.mrb[22].mxu0 }
 0x21c   : > { %v4215_v52 = vadd.f32 %v2294_v43, %v1332_v51  ;;  %v1334_v11 = vpop.f32.mrb[21].mxu1  ;;  %v2303_v48 = vpop.f32.mrb[23].mxu0 }
 0x21d   : > { %v4217_v34 = vadd.f32 %v2296_v1, %v1334_v11 }
 0x21e   : > { %v2454_v3 = vmin.f32 %v2452_v15, %v4215_v52 }
 0x21f   : > { %5239 = vst [vmem:[#allocation15_spill] sm:$0xff] %v4217_v34  ;;  %v2491_v7 = vmin.f32 %v2489_v16, %v4217_v34  ;;  %v1340_v18 = vpop.f32.mrb[22].mxu1  ;;  %v2308_v40 = vpop.f32.mrb[24].mxu0 }
 0x220   : > { %v4221_v41 = vadd.f32 %v2301_v42, %v1340_v18  ;;  %v1342_v55 = vpop.f32.mrb[23].mxu1  ;;  %v2310_v9 = vpop.f32.mrb[25].mxu0 }
 0x221   : > { %v4223_v6 = vadd.f32 %v2303_v48, %v1342_v55 }
 0x222   : > { %v2455_v27 = vmin.f32 %v2453_v57, %v4221_v41 }
 0x223   : > { %5240 = vst [vmem:[#allocation16_spill] sm:$0xff] %v4223_v6  ;;  %v2492_v26 = vmin.f32 %v2490_v32, %v4223_v6  ;;  %v1348_v44 = vpop.f32.mrb[24].mxu1  ;;  %v2315_v47 = vpop.f32.mrb[26].mxu0  ;;  %v3415_v6 = vmov 1966171168  }
 0x224   : > { %v4227_v2 = vadd.f32 %v2308_v40, %v1348_v44  ;;  %v1350_v13 = vpop.f32.mrb[25].mxu1  ;;  %v2317_v5 = vpop.f32.mrb[27].mxu0  ;;  %v2878_v34 = vunpack.c.l.s4 %v3415_v6 }
 0x225   : > { %v4229_v36 = vadd.f32 %v2310_v9, %v1350_v13 }
 0x226   : > { %v2456_v10 = vmin.f32 %v2454_v3, %v4227_v2 }
 0x227   : > { %5241 = vst [vmem:[#allocation17_spill] sm:$0xff] %v4229_v36  ;;  %v2493_v17 = vmin.f32 %v2491_v7, %v4229_v36  ;;  %v1356_v14 = vpop.f32.mrb[26].mxu1  ;;  %v2322_v19 = vpop.f32.mrb[28].mxu0 }
 0x228   : > { %v4233_v21 = vadd.f32 %v2315_v47, %v1356_v14  ;;  %v1358_v22 = vpop.f32.mrb[27].mxu1  ;;  %v2324_v23 = vpop.f32.mrb[29].mxu0 }
 0x229   : > { %v4235_v24 = vadd.f32 %v2317_v5, %v1358_v22 }
 0x22a   : > { %v2457_v29 = vmin.f32 %v2455_v27, %v4233_v21 }
 0x22b   : > { %5242 = vst [vmem:[#allocation18_spill] sm:$0xff] %v4235_v24  ;;  %v2494_v35 = vmin.f32 %v2492_v26, %v4235_v24  ;;  %v1364_v38 = vpop.f32.mrb[28].mxu1  ;;  %v2329_v45 = vpop.f32.mrb[30].mxu0 }
 0x22c   : > { %v4239_v53 = vadd.f32 %v2322_v19, %v1364_v38  ;;  %v1366_v56 = vpop.f32.mrb[29].mxu1  ;;  %v2331_v15 = vpop.f32.mrb[31].mxu0 }
 0x22d   : > { %v4241_v16 = vadd.f32 %v2324_v23, %v1366_v56 }
 0x22e   : > { %v2458_v37 = vmin.f32 %v2456_v10, %v4239_v53 }
 0x22f   : > { %5243 = vst [vmem:[#allocation19_spill] sm:$0xff] %v4241_v16  ;;  %v2495_v43 = vmin.f32 %v2493_v17, %v4241_v16  ;;  %v1372_v59 = vpop.f32.mrb[30].mxu1  ;;  %v2336_v1 = vpop.f32.mrb[32].mxu0 }
 0x230   : > { %v4245_v57 = vadd.f32 %v2329_v45, %v1372_v59  ;;  %v1374_v32 = vpop.f32.mrb[31].mxu1  ;;  %v2338_v51 = vpop.f32.mrb[33].mxu0 }
 0x231   : > { %v4247_v42 = vadd.f32 %v2331_v15, %v1374_v32 }
 0x232   : > { %v2459_v11 = vmin.f32 %v2457_v29, %v4245_v57 }
 0x233   : > { %5244 = vst [vmem:[#allocation20_spill] sm:$0xff] %v4247_v42  ;;  %v2496_v48 = vmin.f32 %v2494_v35, %v4247_v42  ;;  %v1380_v3 = vpop.f32.mrb[32].mxu1  ;;  %v2343_v7 = vpop.f32.mrb[34].mxu0 }
 0x234   : > { %v4251_v18 = vadd.f32 %v2336_v1, %v1380_v3  ;;  %v1382_v40 = vpop.f32.mrb[33].mxu1  ;;  %v2345_v55 = vpop.f32.mrb[35].mxu0 }
 0x235   : > { %v4253_v9 = vadd.f32 %v2338_v51, %v1382_v40 }
 0x236   : > { %v2460_v27 = vmin.f32 %v2458_v37, %v4251_v18 }
 0x237   : > { %5245 = vst [vmem:[#allocation21_spill] sm:$0xff] %v4253_v9  ;;  %v2497_v26 = vmin.f32 %v2495_v43, %v4253_v9  ;;  %v1388_v44 = vpop.f32.mrb[34].mxu1  ;;  %v2350_v47 = vpop.f32.mrb[36].mxu0 }
 0x238   : > { %v4257_v13 = vadd.f32 %v2343_v7, %v1388_v44  ;;  %v1390_v5 = vpop.f32.mrb[35].mxu1  ;;  %v2352_v10 = vpop.f32.mrb[37].mxu0 }
 0x239   : > { %v4259_v17 = vadd.f32 %v2345_v55, %v1390_v5 }
 0x23a   : > { %v2461_v14 = vmin.f32 %v2459_v11, %v4257_v13 }
 0x23b   : > { %5246 = vst [vmem:[#allocation22_spill] sm:$0xff] %v4259_v17  ;;  %v2498_v19 = vmin.f32 %v2496_v48, %v4259_v17  ;;  %v1396_v22 = vpop.f32.mrb[36].mxu1  ;;  %v2357_v23 = vpop.f32.mrb[38].mxu0 }
 0x23c   : > { %v4263_v29 = vadd.f32 %v2350_v47, %v1396_v22  ;;  %v1398_v35 = vpop.f32.mrb[37].mxu1  ;;  %v2359_v38 = vpop.f32.mrb[39].mxu0 }
 0x23d   : > { %v4265_v45 = vadd.f32 %v2352_v10, %v1398_v35 }
 0x23e   : > { %v2462_v56 = vmin.f32 %v2460_v27, %v4263_v29 }
 0x23f   : > { %5247 = vst [vmem:[#allocation23_spill] sm:$0xff] %v4265_v45  ;;  %v2499_v15 = vmin.f32 %v2497_v26, %v4265_v45  ;;  %v1404_v37 = vpop.f32.mrb[38].mxu1  ;;  %v2364_v43 = vpop.f32.mrb[40].mxu0 }
 0x240   : > { %v4269_v59 = vadd.f32 %v2357_v23, %v1404_v37  ;;  %v1406_v1 = vpop.f32.mrb[39].mxu1  ;;  %v2366_v32 = vpop.f32.mrb[41].mxu0 }
 0x241   : > { %v4271_v51 = vadd.f32 %v2359_v38, %v1406_v1 }
 0x242   : > { %v2463_v11 = vmin.f32 %v2461_v14, %v4269_v59 }
 0x243   : > { %5248 = vst [vmem:[#allocation24_spill] sm:$0xff] %v4271_v51  ;;  %v2500_v48 = vmin.f32 %v2498_v19, %v4271_v51  ;;  %v1412_v3 = vpop.f32.mrb[40].mxu1  ;;  %v2371_v7 = vpop.f32.mrb[42].mxu0 }
 0x244   : > { %v4275_v40 = vadd.f32 %v2364_v43, %v1412_v3  ;;  %v1414_v55 = vpop.f32.mrb[41].mxu1  ;;  %v2373_v27 = vpop.f32.mrb[43].mxu0 }
 0x245   : > { %v4277_v44 = vadd.f32 %v2366_v32, %v1414_v55 }
 0x246   : > { %v2464_v26 = vmin.f32 %v2462_v56, %v4275_v40 }
 0x247   : > { %5249 = vst [vmem:[#allocation25_spill] sm:$0xff] %v4277_v44  ;;  %v2501_v47 = vmin.f32 %v2499_v15, %v4277_v44  ;;  %v1420_v5 = vpop.f32.mrb[42].mxu1  ;;  %v2378_v10 = vpop.f32.mrb[44].mxu0 }
 0x248   : > { %v4281_v22 = vadd.f32 %v2371_v7, %v1420_v5  ;;  %v1422_v23 = vpop.f32.mrb[43].mxu1  ;;  %v2380_v14 = vpop.f32.mrb[45].mxu0 }
 0x249   : > { %v4283_v35 = vadd.f32 %v2373_v27, %v1422_v23 }
 0x24a   : > { %v2465_v19 = vmin.f32 %v2463_v11, %v4281_v22 }
 0x24b   : > { %5250 = vst [vmem:[#allocation26_spill] sm:$0xff] %v4283_v35  ;;  %v2502_v38 = vmin.f32 %v2500_v48, %v4283_v35  ;;  %v1428_v37 = vpop.f32.mrb[44].mxu1  ;;  %v2385_v43 = vpop.f32.mrb[46].mxu0 }
 0x24c   : > { %v4287_v1 = vadd.f32 %v2378_v10, %v1428_v37  ;;  %v1430_v32 = vpop.f32.mrb[45].mxu1  ;;  %v2387_v56 = vpop.f32.mrb[47].mxu0 }
 0x24d   : > { %v4289_v3 = vadd.f32 %v2380_v14, %v1430_v32 }
 0x24e   : > { %v2466_v15 = vmin.f32 %v2464_v26, %v4287_v1 }
 0x24f   : > { %5251 = vst [vmem:[#allocation27_spill] sm:$0xff] %v4289_v3  ;;  %v2503_v7 = vmin.f32 %v2501_v47, %v4289_v3  ;;  %v1436_v55 = vpop.f32.mrb[46].mxu1  ;;  %v2392_v5 = vpop.f32.mrb[48].mxu0 }
 0x250   : > { %v4293_v27 = vadd.f32 %v2385_v43, %v1436_v55  ;;  %v1438_v23 = vpop.f32.mrb[47].mxu1  ;;  %v2394_v11 = vpop.f32.mrb[49].mxu0 }
 0x251   : > { %v4295_v44 = vadd.f32 %v2387_v56, %v1438_v23 }
 0x252   : > { %v2467_v48 = vmin.f32 %v2465_v19, %v4293_v27 }
 0x253   : > { %5252 = vst [vmem:[#allocation28_spill] sm:$0xff] %v4295_v44  ;;  %v2504_v10 = vmin.f32 %v2502_v38, %v4295_v44  ;;  %v1444_v37 = vpop.f32.mrb[48].mxu1  ;;  %v2399_v35 = vpop.f32.mrb[50].mxu0 }
 0x254   : > { %v4299_v14 = vadd.f32 %v2392_v5, %v1444_v37  ;;  %v1446_v32 = vpop.f32.mrb[49].mxu1  ;;  %v2401_v26 = vpop.f32.mrb[51].mxu0 }
 0x255   : > { %v4301_v51 = vadd.f32 %v2394_v11, %v1446_v32 }
 0x256   : > { %v2468_v47 = vmin.f32 %v2466_v15, %v4299_v14 }
 0x257   : > { %5253 = vst [vmem:[#allocation29_spill] sm:$0xff] %v4301_v51  ;;  %v2505_v43 = vmin.f32 %v2503_v7, %v4301_v51  ;;  %v1452_v55 = vpop.f32.mrb[50].mxu1  ;;  %v2406_v3 = vpop.f32.mrb[52].mxu0 }
 0x258   : > { %v4305_v56 = vadd.f32 %v2399_v35, %v1452_v55  ;;  %v1454_v23 = vpop.f32.mrb[51].mxu1  ;;  %v2408_v19 = vpop.f32.mrb[53].mxu0 }
 0x259   : > { %v4307_v45 = vadd.f32 %v2401_v26, %v1454_v23 }
 0x25a   : > { %v2469_v38 = vmin.f32 %v2467_v48, %v4305_v56 }
 0x25b   : > { %5254 = vst [vmem:[#allocation30_spill] sm:$0xff] %v4307_v45  ;;  %v2506_v5 = vmin.f32 %v2504_v10, %v4307_v45  ;;  %v1460_v37 = vpop.f32.mrb[52].mxu1  ;;  %v2413_v44 = vpop.f32.mrb[54].mxu0 }
 0x25c   : > { %v4311_v11 = vadd.f32 %v2406_v3, %v1460_v37  ;;  %v1462_v32 = vpop.f32.mrb[53].mxu1  ;;  %v2415_v15 = vpop.f32.mrb[55].mxu0 }
 0x25d   : > { %v4313_v17 = vadd.f32 %v2408_v19, %v1462_v32 }
 0x25e   : > { %v2470_v7 = vmin.f32 %v2468_v47, %v4311_v11 }
 0x25f   : > { %5255 = vst [vmem:[#allocation31_spill] sm:$0xff] %v4313_v17  ;;  %v2507_v35 = vmin.f32 %v2505_v43, %v4313_v17  ;;  %v1468_v55 = vpop.f32.mrb[54].mxu1  ;;  %v2420_v51 = vpop.f32.mrb[56].mxu0 }
 0x260   : > { %v4317_v26 = vadd.f32 %v2413_v44, %v1468_v55  ;;  %v1470_v23 = vpop.f32.mrb[55].mxu1  ;;  %v2422_v48 = vpop.f32.mrb[57].mxu0 }
 0x261   : > { %v4319_v9 = vadd.f32 %v2415_v15, %v1470_v23 }
 0x262   : > { %v2471_v10 = vmin.f32 %v2469_v38, %v4317_v26 }
 0x263   : > { %5256 = vst [vmem:[#allocation32_spill] sm:$0xff] %v4319_v9  ;;  %v2508_v3 = vmin.f32 %v2506_v5, %v4319_v9  ;;  %v1476_v37 = vpop.f32.mrb[56].mxu1  ;;  %v2427_v45 = vpop.f32.mrb[58].mxu0 }
 0x264   : > { %v4323_v19 = vadd.f32 %v2420_v51, %v1476_v37  ;;  %v1478_v32 = vpop.f32.mrb[57].mxu1  ;;  %v2429_v47 = vpop.f32.mrb[59].mxu0 }
 0x265   : > { %v4325_v42 = vadd.f32 %v2422_v48, %v1478_v32 }
 0x266   : > { %v2472_v43 = vmin.f32 %v2470_v7, %v4323_v19 }
 0x267   : > { %5257 = vst [vmem:[#allocation33_spill] sm:$0xff] %v4325_v42  ;;  %v2509_v44 = vmin.f32 %v2507_v35, %v4325_v42  ;;  %v1484_v55 = vpop.f32.mrb[58].mxu1  ;;  %v2434_v17 = vpop.f32.mrb[60].mxu0 }
 0x268   : > { %v4329_v15 = vadd.f32 %v2427_v45, %v1484_v55  ;;  %v1486_v23 = vpop.f32.mrb[59].mxu1  ;;  %v2436_v38 = vpop.f32.mrb[61].mxu0 }
 0x269   : > { %v4331_v16 = vadd.f32 %v2429_v47, %v1486_v23 }
 0x26a   : > { %v2473_v5 = vmin.f32 %v2471_v10, %v4329_v15 }
 0x26b   : > { %5258 = vst [vmem:[#allocation34_spill] sm:$0xff] %v4331_v16  ;;  %v2510_v51 = vmin.f32 %v2508_v3, %v4331_v16  ;;  %v1492_v37 = vpop.f32.mrb[60].mxu1  ;;  %v2441_v9 = vpop.f32.mrb[62].mxu0  ;;  %v5261_v3 = vlaneseq }
 0x26c   : > { %v4335_v48 = vadd.f32 %v2434_v17, %v1492_v37  ;;  %v1494_v32 = vpop.f32.mrb[61].mxu1  ;;  %v2443_v7 = vpop.f32.mrb[63].mxu0 }
 0x26d   : > { %v4337_v24 = vadd.f32 %v2436_v38, %v1494_v32  ;;  %v4347_v16 = vshrl.u32 %v5261_v3, 7 }
 0x26e   : > { %v2474_v35 = vmin.f32 %v2472_v43, %v4335_v48 }
 0x26f   : > { %5259 = vst [vmem:[#allocation35_spill] sm:$0xff] %v4337_v24  ;;  %v2511_v45 = vmin.f32 %v2509_v44, %v4337_v24  ;;  %v1500_v55 = vpop.f32.mrb[62].mxu1  ;;  %v4351_v38 = vadd.s32 8, %v4347_v16  ;;  %v4354_v43 = vadd.s32 16, %v4347_v16  ;;  %v4360_v32 = vadd.s32 32, %v4347_v16 }
 0x270   : > { %v4341_v42 = vadd.f32 %v2441_v9, %v1500_v55  ;;  %v1502_v47 = vpop.f32.mrb[63].mxu1  ;;  %v4357_v9 = vadd.s32 24, %v4347_v16  ;;  %v4372_v55 = vadd.s32 64, %v4347_v16  ;;  %v4381_v3 = vadd.s32 88, %v4347_v16 }
 0x271   : > { %v4343_v23 = vadd.f32 %v2443_v7, %v1502_v47  ;;  %v4387_v24 = vadd.s32 104, %v4347_v16  ;;  %v4390_v30 = vadd.s32 112, %v4347_v16  ;;  %v4393_v62 = vadd.s32 120, %v4347_v16 }
 0x272   : > { %v2475_v10 = vmin.f32 %v2473_v5, %v4341_v42  ;;  %v4363_v5 = vadd.s32 40, %v4347_v16  ;;  %v4396_v28 = vadd.s32 128, %v4347_v16  ;;  %v4411_v39 = vadd.s32 168, %v4347_v16 }
 0x273   : > { %5260 = vst [vmem:[#allocation36_spill] sm:$0xff] %v4343_v23  ;;  %v2512_v17 = vmin.f32 %v2510_v51, %v4343_v23  ;;  %v4366_v51 = vadd.s32 48, %v4347_v16  ;;  %v4384_v23 = vadd.s32 96, %v4347_v16  ;;  %v4414_v60 = vadd.s32 176, %v4347_v16 }
 0x274   : > { %v2476_v37 = vmin.f32 %v2474_v35, %v2475_v10  ;;  %v4369_v35 = vadd.s32 56, %v4347_v16  ;;  %v4375_v10 = vadd.s32 72, %v4347_v16  ;;  %5262 = vst [vmem:[#allocation37_spill] sm:$0xff] %v4396_v28  ;;  %5267 = vst [vmem:[#allocation42_spill] sm:$0xff] %v4411_v39  ;;  %v2858_v28 = vld [vmem:[#allocation2] sm:$0x3] }
 0x275   : > { %v2513_v44 = vmin.f32 %v2511_v45, %v2512_v17  ;;  %v4378_v45 = vadd.s32 80, %v4347_v16  ;;  %5268 = vst [vmem:[#allocation43_spill] sm:$0xff] %v4414_v60  ;;  %v4428_v60 = vadd.s32 208, %v4347_v16  ;;  %v4443_v31 = vadd.s32 248, %v4347_v16 }
 0x276   : > { %v2477_v7 = vrot.slane %v2476_v37, 4 }
 0x277   : > { %v2514_v47 = vrot.slane %v2513_v44, 4  ;;  %5272 = vst [vmem:[#allocation47_spill] sm:$0xff] %v4428_v60  ;;  %5277 = vst [vmem:[#allocation52_spill] sm:$0xff] %v4443_v31  ;;  %v5279_v60 = vsub.s32 0, %v4347_v16 }
 0x278   : > { %v2478_v17 = vmin.f32 %v2476_v37, %v2477_v7  ;;  %v4399_v37 = vadd.s32 136, %v4347_v16  ;;  %v4402_v7 = vadd.s32 144, %v4347_v16 }
 0x279   : > { %v2515_v36 = vmin.f32 %v2513_v44, %v2514_v47  ;;  %v4405_v44 = vadd.s32 152, %v4347_v16  ;;  %v4408_v47 = vadd.s32 160, %v4347_v16 }
 0x27a   : > { %v2479_v8 = vrot.slane %v2478_v17, 2  ;;  %5263 = vst [vmem:[#allocation38_spill] sm:$0xff] %v4399_v37  ;;  %5264 = vst [vmem:[#allocation39_spill] sm:$0xff] %v4402_v7  ;;  %v2879_v7 = vunpack.c.0.s8 %v2878_v34  ;;  %v4419_v37 = vadd.s32 184, %v4347_v16 }
 0x27b   : > { %5265 = vst [vmem:[#allocation40_spill] sm:$0xff] %v4405_v44  ;;  %v2516_v6 = vrot.slane %v2515_v36, 2  ;;  %5266 = vst [vmem:[#allocation41_spill] sm:$0xff] %v4408_v47  ;;  %v4422_v44 = vadd.s32 192, %v4347_v16  ;;  %v4425_v47 = vadd.s32 200, %v4347_v16 }
 0x27c   : > { %v2480_v25 = vmin.f32 %v2478_v17, %v2479_v8  ;;  %5269 = vst [vmem:[#allocation44_spill] sm:$0xff] %v4419_v37  ;;  %v4431_v8 = vadd.s32 216, %v4347_v16  ;;  %v4437_v17 = vadd.s32 232, %v4347_v16 }
 0x27d   : > { %v2517_v20 = vmin.f32 %v2515_v36, %v2516_v6  ;;  %5270 = vst [vmem:[#allocation45_spill] sm:$0xff] %v4422_v44  ;;  %5271 = vst [vmem:[#allocation46_spill] sm:$0xff] %v4425_v47  ;;  %v4434_v36 = vadd.s32 224, %v4347_v16  ;;  %v4440_v6 = vadd.s32 240, %v4347_v16  ;;  %v4449_v47 = vrot.slane %v2858_v28, %v5279_v60 }
 0x27e   : > { %v2481_v39 = vrot.slane %v2480_v25, 1  ;;  %5273 = vst [vmem:[#allocation48_spill] sm:$0xff] %v4431_v8  ;;  %5275 = vst [vmem:[#allocation50_spill] sm:$0xff] %v4437_v17  ;;  %v4458_v17 = vsub.s32 %v2879_v7, %v4347_v16 }
 0x27f   : > { %5274 = vst [vmem:[#allocation49_spill] sm:$0xff] %v4434_v36  ;;  %v2518_v34 = vrot.slane %v2517_v20, 1  ;;  %5276 = vst [vmem:[#allocation51_spill] sm:$0xff] %v4440_v6  ;;  %v5281_v36 = vsub.s32 1, %v4347_v16 }
 0x280   : > { %v4445_v33 = vmin.f32 %v2480_v25, %v2481_v39  ;;  %5280 = vst [vmem:[#allocation54_spill] sm:$0xff] %v4449_v47  ;;  %5283 = vst [vmem:[#allocation56_spill] sm:$0xff] %v4458_v17 }
 0x281   : > { %v4451_v8 = vmin.f32 %v2517_v20, %v2518_v34  ;;  %v4455_v44 = vrot.slane %v2858_v28, %v5281_v36 }
 0x282   : > { %5278 = vst [vmem:[#allocation53_spill] sm:$0xff] %v4445_v33  ;;  %vm2520_vm2 = vcmp.le.f32.partialorder %v4155_v63, %v4445_v33  ;;  %vm2522_vm3 = vcmp.le.f32.partialorder %v4159_v50, %v4445_v33  ;;  %vm2524_vm4 = vcmp.le.f32.partialorder %v4163_v49, %v4445_v33  ;;  %vm2526_vm5 = vcmp.le.f32.partialorder %v4171_v4, %v4445_v33 }
 0x283   : > { %5282 = vst [vmem:[#allocation55_spill] sm:$0xff] %v4455_v44  ;;  %vm2528_vm6 = vcmp.le.f32.partialorder %v4179_v12, %v4445_v33  ;;  %vm2530_vm7 = vcmp.le.f32.partialorder %v4185_v54, %v4445_v33  ;;  %vm2532_vm8 = vcmp.le.f32.partialorder %v4191_v61, %v4445_v33  ;;  %vm2534_vm9 = vcmp.le.f32.partialorder %v4197_v0, %v4445_v33 }
 0x284   : > { %vm2570_vm13 = vcmp.le.f32.partialorder %v4305_v56, %v4445_v33  ;;  %vm2572_vm14 = vcmp.le.f32.partialorder %v4311_v11, %v4445_v33  ;;  %vm2574_vm15 = vcmp.le.f32.partialorder %v4317_v26, %v4445_v33  ;;  %vm2576_vm1 = vcmp.le.f32.partialorder %v4323_v19, %v4445_v33  ;;  %v5316_v19 = vld [vmem:[#allocation5_spill] sm:$0xff] }
 0x285   : > { %vm2578_vm10 = vcmp.le.f32.partialorder %v4329_v15, %v4445_v33  ;;  %vm2580_vm11 = vcmp.le.f32.partialorder %v4335_v48, %v4445_v33  ;;  %vm2582_vm12 = vcmp.le.f32.partialorder %v4341_v42, %v4445_v33  ;;  %v2648_v20 = vsel %vm2520_vm2, %v4347_v16, 256  ;;  %v5313_v56 = vld [vmem:[#allocation50_spill] sm:$0xff] }
 0x286   : > { %v2650_v25 = vsel %vm2522_vm3, %v4351_v38, 256  ;;  %v2652_v60 = vsel %vm2524_vm4, %v4354_v43, 256  ;;  %v2654_v39 = vsel %vm2526_vm5, %v4357_v9, 256  ;;  %v2656_v63 = vsel %vm2528_vm6, %v4360_v32, 256  ;;  %v5318_v42 = vld [vmem:[#allocation6_spill] sm:$0xff] }
 0x287   : > { %v2658_v50 = vsel %vm2530_vm7, %v4363_v5, 256  ;;  %v2660_v49 = vsel %vm2532_vm8, %v4366_v51, 256  ;;  %v2662_v4 = vsel %vm2534_vm9, %v4369_v35, 256  ;;  %vm5284_vm2 = vcmp.le.f32.partialorder %v4203_v46, %v4445_v33 }
 0x288   : > { %v2664_v12 = vsel %vm5284_vm2, %v4372_v55, 256  ;;  %vm5285_vm3 = vcmp.le.f32.partialorder %v4209_v58, %v4445_v33  ;;  %vm5286_vm4 = vcmp.le.f32.partialorder %v4215_v52, %v4445_v33  ;;  %vm5287_vm5 = vcmp.le.f32.partialorder %v4221_v41, %v4445_v33  ;;  %v5292_v41 = vld [vmem:[#allocation37_spill] sm:$0xff] }
 0x289   : > { %v2666_v54 = vsel %vm5285_vm3, %v4375_v10, 256  ;;  %v2668_v61 = vsel %vm5286_vm4, %v4378_v45, 256  ;;  %v2670_v0 = vsel %vm5287_vm5, %v4381_v3, 256  ;;  %vm5288_vm6 = vcmp.le.f32.partialorder %v4227_v2, %v4445_v33 }
 0x28a   : > { %v4576_v28 = vsel %vm5288_vm6, %v4384_v23, 256  ;;  %vm5289_vm7 = vcmp.le.f32.partialorder %v4233_v21, %v4445_v33  ;;  %vm5290_vm8 = vcmp.le.f32.partialorder %v4239_v53, %v4445_v33  ;;  %vm5291_vm9 = vcmp.le.f32.partialorder %v4245_v57, %v4445_v33  ;;  %v5294_v21 = vld [vmem:[#allocation38_spill] sm:$0xff]  ;;  %v5296_v53 = vld [vmem:[#allocation39_spill] sm:$0xff]  ;;  %v5298_v57 = vld [vmem:[#allocation40_spill] sm:$0xff] }
 0x28b   : > { %v4582_v46 = vsel %vm5289_vm7, %v4387_v24, 256  ;;  %v4588_v58 = vsel %vm5290_vm8, %v4390_v30, 256  ;;  %v4594_v52 = vsel %vm5291_vm9, %v4393_v62, 256  ;;  %vm5293_vm2 = vcmp.le.f32.partialorder %v4251_v18, %v4445_v33  ;;  %v5300_v18 = vld [vmem:[#allocation41_spill] sm:$0xff] }
 0x28c   : > { %v4600_v2 = vsel %vm5293_vm2, %v5292_v41, 256  ;;  %vm5295_vm3 = vcmp.le.f32.partialorder %v4257_v13, %v4445_v33  ;;  %vm5297_vm4 = vcmp.le.f32.partialorder %v4263_v29, %v4445_v33  ;;  %vm5299_vm5 = vcmp.le.f32.partialorder %v4269_v59, %v4445_v33  ;;  %v5302_v13 = vld [vmem:[#allocation42_spill] sm:$0xff]  ;;  %v5304_v29 = vld [vmem:[#allocation43_spill] sm:$0xff] }
 0x28d   : > { %v4606_v7 = vsel %vm5295_vm3, %v5294_v21, 256  ;;  %v4612_v36 = vsel %vm5297_vm4, %v5296_v53, 256  ;;  %v4618_v34 = vsel %vm5299_vm5, %v5298_v57, 256  ;;  %vm5301_vm6 = vcmp.le.f32.partialorder %v4275_v40, %v4445_v33  ;;  %v5307_v40 = vld [vmem:[#allocation45_spill] sm:$0xff] }
 0x28e   : > { %v4624_v17 = vsel %vm5301_vm6, %v5300_v18, 256  ;;  %vm5303_vm7 = vcmp.le.f32.partialorder %v4281_v22, %v4445_v33  ;;  %vm5305_vm8 = vcmp.le.f32.partialorder %v4287_v1, %v4445_v33  ;;  %vm5306_vm9 = vcmp.le.f32.partialorder %v4293_v27, %v4445_v33  ;;  %v5309_v22 = vld [vmem:[#allocation46_spill] sm:$0xff]  ;;  %v5310_v1 = vld [vmem:[#allocation47_spill] sm:$0xff]  ;;  %v5311_v27 = vld [vmem:[#allocation48_spill] sm:$0xff] }
 0x28f   : > { %v4630_v44 = vsel %vm5303_vm7, %v5302_v13, 256  ;;  %v4636_v53 = vsel %vm5305_vm8, %v5304_v29, 256  ;;  %v4642_v59 = vsel %vm5306_vm9, %v4419_v37, 256  ;;  %vm5308_vm2 = vcmp.le.f32.partialorder %v4299_v14, %v4445_v33  ;;  %v5312_v14 = vld [vmem:[#allocation49_spill] sm:$0xff] }
 0x290   : > { %v4648_v18 = vsel %vm5308_vm2, %v5307_v40, 256  ;;  %v4654_v13 = vsel %vm2570_vm13, %v5309_v22, 256  ;;  %v4660_v29 = vsel %vm2572_vm14, %v5310_v1, 256  ;;  %v4666_v37 = vsel %vm2574_vm15, %v5311_v27, 256  ;;  %v5325_v27 = vld [vmem:[#allocation13_spill] sm:$0xff] }
 0x291   : > { %v4672_v40 = vsel %vm2576_vm1, %v5312_v14, 256  ;;  %v4678_v22 = vsel %vm2578_vm10, %v5313_v56, 256  ;;  %v4684_v11 = vsel %vm2580_vm11, %v4440_v6, 256  ;;  %v4690_v26 = vsel %vm2582_vm12, %v4443_v31, 256  ;;  %v5319_v31 = vld [vmem:[#allocation7_spill] sm:$0xff]  ;;  %v5320_v6 = vld [vmem:[#allocation8_spill] sm:$0xff] }
 0x292   : > { %5314 = vst [vmem:[#allocation37_spill] sm:$0xff] %v4684_v11  ;;  %5315 = vst [vmem:[#allocation38_spill] sm:$0xff] %v4690_v26  ;;  %vm2712_vm13 = vcmp.lt.s32.totalorder %v2648_v20, %v2652_v60  ;;  %vm2714_vm14 = vcmp.lt.s32.totalorder %v2650_v25, %v2654_v39  ;;  %vm5197_vm15 = vcmp.lt.f32.partialorder %v4445_v33, %v4449_v47  ;;  %v5329_v26 = vld [vmem:[#allocation17_spill] sm:$0xff] }
 0x293   : > { %vm2521_vm10 = vcmp.le.f32.partialorder %v5316_v19, %v4451_v8  ;;  %v2713_v15 = vsel %vm2712_vm13, %v2648_v20, %v2652_v60  ;;  %v2715_v56 = vsel %vm2714_vm14, %v2650_v25, %v2654_v39  ;;  %v4701_v48 = vsel %vm5197_vm15, %v4445_v33, %v4449_v47  ;;  %v5321_v60 = vld [vmem:[#allocation9_spill] sm:$0xff]  ;;  %v5322_v39 = vld [vmem:[#allocation10_spill] sm:$0xff]  ;;  %v5323_v47 = vld [vmem:[#allocation11_spill] sm:$0xff] }
 0x294   : > { %5317 = vst [vmem:[#allocation5_spill] sm:$0xff] %v4701_v48  ;;  %vm2523_vm11 = vcmp.le.f32.partialorder %v5318_v42, %v4451_v8  ;;  %vm2716_vm12 = vcmp.lt.s32.totalorder %v2713_v15, %v2656_v63  ;;  %vm2718_vm1 = vcmp.lt.s32.totalorder %v2715_v56, %v2658_v50  ;;  %vm2525_vm3 = vcmp.le.f32.partialorder %v5319_v31, %v4451_v8  ;;  %v5324_v33 = vld [vmem:[#allocation12_spill] sm:$0xff]  ;;  %v5333_v57 = vld [vmem:[#allocation21_spill] sm:$0xff] }
 0x295   : > { %vm2527_vm4 = vcmp.le.f32.partialorder %v5320_v6, %v4451_v8  ;;  %v2717_v20 = vsel %vm2716_vm12, %v2713_v15, %v2656_v63  ;;  %v2719_v25 = vsel %vm2718_vm1, %v2715_v56, %v2658_v50  ;;  %vm2529_vm5 = vcmp.le.f32.partialorder %v5321_v60, %v4451_v8  ;;  %v5326_v63 = vld [vmem:[#allocation14_spill] sm:$0xff]  ;;  %v5327_v50 = vld [vmem:[#allocation15_spill] sm:$0xff]  ;;  %v5328_v56 = vld [vmem:[#allocation16_spill] sm:$0xff] }
 0x296   : > { %vm2720_vm7 = vcmp.lt.s32.totalorder %v2717_v20, %v2660_v49  ;;  %vm2722_vm8 = vcmp.lt.s32.totalorder %v2719_v25, %v2662_v4  ;;  %vm2541_vm15 = vcmp.le.f32.partialorder %v5327_v50, %v4451_v8  ;;  %v5375_v50 = vld [vmem:[#allocation44_spill] sm:$0xff] }
 0x297   : > { %v2721_v48 = vsel %vm2720_vm7, %v2717_v20, %v2660_v49  ;;  %v2723_v14 = vsel %vm2722_vm8, %v2719_v25, %v2662_v4  ;;  %v5330_v49 = vld [vmem:[#allocation18_spill] sm:$0xff]  ;;  %v5331_v4 = vld [vmem:[#allocation19_spill] sm:$0xff]  ;;  %v5332_v20 = vld [vmem:[#allocation20_spill] sm:$0xff] }
 0x298   : > { %vm2724_vm12 = vcmp.lt.s32.totalorder %v2721_v48, %v2664_v12  ;;  %vm2726_vm1 = vcmp.lt.s32.totalorder %v2723_v14, %v2666_v54  ;;  %vm2551_vm9 = vcmp.le.f32.partialorder %v5332_v20, %v4451_v8  ;;  %v5377_v20 = vld [vmem:[#allocation45_spill] sm:$0xff] }
 0x299   : > { %v2725_v15 = vsel %vm2724_vm12, %v2721_v48, %v2664_v12  ;;  %v2727_v1 = vsel %vm2726_vm1, %v2723_v14, %v2666_v54  ;;  %v5334_v12 = vld [vmem:[#allocation22_spill] sm:$0xff]  ;;  %v5336_v14 = vld [vmem:[#allocation24_spill] sm:$0xff]  ;;  %v5370_v60 = vld [vmem:[#allocation37_spill] sm:$0xff] }
 0x29a   : > { %vm2728_vm13 = vcmp.lt.s32.totalorder %v2725_v15, %v2668_v61  ;;  %vm2730_vm2 = vcmp.lt.s32.totalorder %v2727_v1, %v2670_v0  ;;  %v5340_v54 = vld [vmem:[#allocation28_spill] sm:$0xff] }
 0x29b   : > { %v2729_v25 = vsel %vm2728_vm13, %v2725_v15, %v2668_v61  ;;  %v2731_v11 = vsel %vm2730_vm2, %v2727_v1, %v2670_v0  ;;  %v5337_v0 = vld [vmem:[#allocation25_spill] sm:$0xff]  ;;  %v5344_v15 = vld [vmem:[#allocation32_spill] sm:$0xff] }
 0x29c   : > { %vm2732_vm7 = vcmp.lt.s32.totalorder %v2729_v25, %v4576_v28  ;;  %vm2734_vm8 = vcmp.lt.s32.totalorder %v2731_v11, %v4582_v46  ;;  %v5348_v1 = vld [vmem:[#allocation36_spill] sm:$0xff] }
 0x29d   : > { %v2733_v48 = vsel %vm2732_vm7, %v2729_v25, %v4576_v28  ;;  %v2735_v61 = vsel %vm2734_vm8, %v2731_v11, %v4582_v46  ;;  %v5341_v11 = vld [vmem:[#allocation29_spill] sm:$0xff]  ;;  %v5347_v25 = vld [vmem:[#allocation35_spill] sm:$0xff]  ;;  %vm2583_vm14 = vcmp.le.f32.partialorder %v5348_v1, %v4451_v8 }
 0x29e   : > { %vm2736_vm1 = vcmp.lt.s32.totalorder %v2733_v48, %v4588_v58  ;;  %vm2738_vm12 = vcmp.lt.s32.totalorder %v2735_v61, %v4594_v52  ;;  %vm2581_vm6 = vcmp.le.f32.partialorder %v5347_v25, %v4451_v8 }
 0x29f   : > { %v2737_v28 = vsel %vm2736_vm1, %v2733_v48, %v4588_v58  ;;  %v2739_v46 = vsel %vm2738_vm12, %v2735_v61, %v4594_v52  ;;  %v5345_v48 = vld [vmem:[#allocation33_spill] sm:$0xff]  ;;  %v5346_v61 = vld [vmem:[#allocation34_spill] sm:$0xff] }
 0x2a0   : > { %vm2740_vm13 = vcmp.lt.s32.totalorder %v2737_v28, %v4600_v2  ;;  %vm2742_vm2 = vcmp.lt.s32.totalorder %v2739_v46, %v4606_v7  ;;  %vm2577_vm12 = vcmp.le.f32.partialorder %v5345_v48, %v4451_v8  ;;  %vm2579_vm1 = vcmp.le.f32.partialorder %v5346_v61, %v4451_v8  ;;  %v5391_v61 = vld [vmem:[#allocation55_spill] sm:$0xff] }
 0x2a1   : > { %v2741_v58 = vsel %vm2740_vm13, %v2737_v28, %v4600_v2  ;;  %v2743_v52 = vsel %vm2742_vm2, %v2739_v46, %v4606_v7  ;;  %v4785_v28 = vsel %vm2521_vm10, %v4347_v16, 256  ;;  %v4791_v46 = vsel %vm2523_vm11, %v4351_v38, 256 }
 0x2a2   : > { %vm2744_vm8 = vcmp.lt.s32.totalorder %v2741_v58, %v4612_v36  ;;  %vm2746_vm7 = vcmp.lt.s32.totalorder %v2743_v52, %v4618_v34  ;;  %v4809_v38 = vsel %vm2529_vm5, %v4360_v32, 256  ;;  %vm5349_vm10 = vcmp.le.f32.partialorder %v5322_v39, %v4451_v8  ;;  %v5371_v39 = vld [vmem:[#allocation38_spill] sm:$0xff] }
 0x2a3   : > { %v2745_v2 = vsel %vm2744_vm8, %v2741_v58, %v4612_v36  ;;  %v2747_v7 = vsel %vm2746_vm7, %v2743_v52, %v4618_v34  ;;  %v2653_v36 = vsel %vm2525_vm3, %v4354_v43, 256  ;;  %v2655_v34 = vsel %vm2527_vm4, %v4357_v9, 256  ;;  %v5383_v52 = vld [vmem:[#allocation31_spill] sm:$0xff] }
 0x2a4   : > { %vm2748_vm2 = vcmp.lt.s32.totalorder %v2745_v2, %v4624_v17  ;;  %vm2750_vm13 = vcmp.lt.s32.totalorder %v2747_v7, %v4630_v44  ;;  %v4815_v31 = vsel %vm5349_vm10, %v4363_v5, 256  ;;  %vm5350_vm4 = vcmp.le.f32.partialorder %v5323_v47, %v4451_v8 }
 0x2a5   : > { %v2749_v19 = vsel %vm2748_vm2, %v2745_v2, %v4624_v17  ;;  %v2751_v42 = vsel %vm2750_vm13, %v2747_v7, %v4630_v44  ;;  %v4823_v43 = vsel %vm5350_vm4, %v4366_v51, 256  ;;  %vm5351_vm5 = vcmp.le.f32.partialorder %v5324_v33, %v4451_v8  ;;  %v5385_v7 = vld [vmem:[#allocation48_spill] sm:$0xff] }
 0x2a6   : > { %vm2752_vm11 = vcmp.lt.s32.totalorder %v2749_v19, %v4636_v53  ;;  %vm2754_vm3 = vcmp.lt.s32.totalorder %v2751_v42, %v4642_v59  ;;  %v4829_v9 = vsel %vm5351_vm5, %v4369_v35, 256  ;;  %vm5352_vm7 = vcmp.le.f32.partialorder %v5325_v27, %v4451_v8  ;;  %v5368_v27 = vld [vmem:[#allocation26_spill] sm:$0xff] }
 0x2a7   : > { %v2753_v32 = vsel %vm2752_vm11, %v2749_v19, %v4636_v53  ;;  %v2755_v5 = vsel %vm2754_vm3, %v2751_v42, %v4642_v59  ;;  %v4837_v44 = vsel %vm5352_vm7, %v4372_v55, 256  ;;  %vm5353_vm8 = vcmp.le.f32.partialorder %v5326_v63, %v4451_v8  ;;  %v5361_v53 = vld [vmem:[#allocation23_spill] sm:$0xff]  ;;  %v5367_v59 = vld [vmem:[#allocation42_spill] sm:$0xff]  ;;  %v5387_v19 = vld [vmem:[#allocation49_spill] sm:$0xff] }
 0x2a8   : > { %v4843_v51 = vsel %vm5353_vm8, %v4375_v10, 256  ;;  %vm2756_vm2 = vcmp.lt.s32.totalorder %v2753_v32, %v4648_v18  ;;  %vm2758_vm13 = vcmp.lt.s32.totalorder %v2755_v5, %v4654_v13  ;;  %v4851_v33 = vsel %vm2541_vm15, %v4378_v45, 256  ;;  %v5372_v63 = vld [vmem:[#allocation43_spill] sm:$0xff] }
 0x2a9   : > { %vm5354_vm10 = vcmp.le.f32.partialorder %v5328_v56, %v4451_v8  ;;  %v2757_v55 = vsel %vm2756_vm2, %v2753_v32, %v4648_v18  ;;  %v2759_v10 = vsel %vm2758_vm13, %v2755_v5, %v4654_v13  ;;  %vm5355_vm11 = vcmp.le.f32.partialorder %v5329_v26, %v4451_v8  ;;  %v5363_v18 = vld [vmem:[#allocation40_spill] sm:$0xff]  ;;  %v5365_v13 = vld [vmem:[#allocation41_spill] sm:$0xff]  ;;  %v5388_v5 = vld [vmem:[#allocation50_spill] sm:$0xff] }
 0x2aa   : > { %v4857_v35 = vsel %vm5354_vm10, %v4381_v3, 256  ;;  %v4865_v47 = vsel %vm5355_vm11, %v4384_v23, 256  ;;  %vm5356_vm15 = vcmp.le.f32.partialorder %v5330_v49, %v4451_v8  ;;  %vm2760_vm3 = vcmp.lt.s32.totalorder %v2757_v55, %v4660_v29 }
 0x2ab   : > { %v4871_v45 = vsel %vm5356_vm15, %v4387_v24, 256  ;;  %vm2762_vm4 = vcmp.lt.s32.totalorder %v2759_v10, %v4666_v37  ;;  %vm5357_vm5 = vcmp.le.f32.partialorder %v5331_v4, %v4451_v8  ;;  %v4885_v23 = vsel %vm2551_vm9, %v4393_v62, 256  ;;  %v5360_v62 = vld [vmem:[#allocation39_spill] sm:$0xff] }
 0x2ac   : > { %v4879_v3 = vsel %vm5357_vm5, %v4390_v30, 256  ;;  %v2761_v17 = vsel %vm2760_vm3, %v2757_v55, %v4660_v29  ;;  %v2763_v24 = vsel %vm2762_vm4, %v2759_v10, %v4666_v37  ;;  %vm5358_vm7 = vcmp.le.f32.partialorder %v5333_v57, %v4451_v8  ;;  %v5389_v10 = vld [vmem:[#allocation51_spill] sm:$0xff] }
 0x2ad   : > { %v4893_v6 = vsel %vm5358_vm7, %v5292_v41, 256  ;;  %vm5359_vm8 = vcmp.le.f32.partialorder %v5334_v12, %v4451_v8  ;;  %vm2764_vm2 = vcmp.lt.s32.totalorder %v2761_v17, %v4672_v40  ;;  %vm2766_vm9 = vcmp.lt.s32.totalorder %v2763_v24, %v4678_v22 }
 0x2ae   : > { %v4899_v30 = vsel %vm5359_vm8, %v5294_v21, 256  ;;  %vm5362_vm13 = vcmp.le.f32.partialorder %v5361_v53, %v4451_v8  ;;  %vm5364_vm10 = vcmp.le.f32.partialorder %v5336_v14, %v4451_v8  ;;  %v2765_v57 = vsel %vm2764_vm2, %v2761_v17, %v4672_v40  ;;  %v5373_v40 = vld [vmem:[#allocation27_spill] sm:$0xff]  ;;  %v5379_v14 = vld [vmem:[#allocation46_spill] sm:$0xff]  ;;  %v5390_v17 = vld [vmem:[#allocation52_spill] sm:$0xff] }
 0x2af   : > { %v4907_v37 = vsel %vm5362_vm13, %v5360_v62, 256  ;;  %v4913_v41 = vsel %vm5364_vm10, %v5363_v18, 256  ;;  %v2767_v21 = vsel %vm2766_vm9, %v2763_v24, %v4678_v22  ;;  %vm5366_vm11 = vcmp.le.f32.partialorder %v5337_v0, %v4451_v8  ;;  %v5380_v0 = vld [vmem:[#allocation30_spill] sm:$0xff]  ;;  %v5392_v53 = vld [vmem:[#allocation5_spill] sm:$0xff] }
 0x2b0   : > { %v4921_v29 = vsel %vm5366_vm11, %v5365_v13, 256  ;;  %vm5369_vm15 = vcmp.le.f32.partialorder %v5368_v27, %v4451_v8  ;;  %vm2768_vm3 = vcmp.lt.s32.totalorder %v2765_v57, %v5370_v60  ;;  %vm2770_vm4 = vcmp.lt.s32.totalorder %v2767_v21, %v5371_v39  ;;  %v5013_v13 = vld [vmem:[%s3470_s24] sm:$0x3] }
 0x2b1   : > { %v4927_v26 = vsel %vm5369_vm15, %v5367_v59, 256  ;;  %vm5374_vm5 = vcmp.le.f32.partialorder %v5373_v40, %v4451_v8  ;;  %vm5376_vm7 = vcmp.le.f32.partialorder %v5340_v54, %v4451_v8  ;;  %v2769_v49 = vsel %vm2768_vm3, %v2765_v57, %v5370_v60  ;;  %v5382_v54 = vld [vmem:[#allocation47_spill] sm:$0xff] }
 0x2b2   : > { %v4935_v22 = vsel %vm5374_vm5, %v5372_v63, 256  ;;  %v4941_v56 = vsel %vm5376_vm7, %v5375_v50, 256  ;;  %v2771_v4 = vsel %vm2770_vm4, %v2767_v21, %v5371_v39  ;;  %vm5378_vm8 = vcmp.le.f32.partialorder %v5341_v11, %v4451_v8 }
 0x2b3   : > { %v4949_v12 = vsel %vm5378_vm8, %v5377_v20, 256  ;;  %vm5381_vm2 = vcmp.le.f32.partialorder %v5380_v0, %v4451_v8  ;;  %vm2772_vm9 = vcmp.lt.s32.totalorder %v2769_v49, %v2771_v4  ;;  %vm5384_vm13 = vcmp.le.f32.partialorder %v5383_v52, %v4451_v8  ;;  %v5396_v20 = vld [vmem:[#allocation53_spill] sm:$0xff] }
 0x2b4   : > { %v4955_v58 = vsel %vm5381_vm2, %v5379_v14, 256  ;;  %v4961_v2 = vsel %vm5384_vm13, %v5382_v54, 256  ;;  %vm5386_vm10 = vcmp.le.f32.partialorder %v5344_v15, %v4451_v8  ;;  %v4973_v42 = vsel %vm2577_vm12, %v5387_v19, 256  ;;  %v5397_v14 = vld [vmem:[#allocation54_spill] sm:$0xff] }
 0x2b5   : > { %v4967_v11 = vsel %vm5386_vm10, %v5385_v7, 256  ;;  %v2773_v32 = vsel %vm2772_vm9, %v2769_v49, %v2771_v4  ;;  %v4979_v55 = vsel %vm2579_vm1, %v5388_v5, 256  ;;  %v4985_v15 = vsel %vm2581_vm6, %v5389_v10, 256 }
 0x2b6   : > { %v4991_v48 = vsel %vm2583_vm14, %v5390_v17, 256  ;;  %v2774_v24 = vrot.slane %v2773_v32, 4  ;;  %vm2783_vm12 = vcmp.lt.s32.totalorder %v4785_v28, %v2653_v36  ;;  %vm2785_vm11 = vcmp.lt.s32.totalorder %v4791_v46, %v2655_v34 }
 0x2b7   : > { %vm2871_vm1 = vcmp.lt.f32.partialorder %v4451_v8, %v5391_v61  ;;  %v2784_v62 = vsel %vm2783_vm12, %v4785_v28, %v2653_v36  ;;  %v2786_v25 = vsel %vm2785_vm11, %v4791_v46, %v2655_v34  ;;  %v5393_v46 = vld [vmem:[#allocation56_spill] sm:$0xff]  ;;  %v5394_v40 = vsub.s32 0, %v4347_v16 }
 0x2b8   : > { %v2873_v1 = vsel %vm2871_vm1, %v4451_v8, %v5391_v61  ;;  %vm2775_vm6 = vcmp.lt.s32.totalorder %v2773_v32, %v2774_v24  ;;  %vm2787_vm14 = vcmp.lt.s32.totalorder %v2784_v62, %v4809_v38  ;;  %vm2789_vm15 = vcmp.lt.s32.totalorder %v2786_v25, %v4815_v31 }
 0x2b9   : > { %v2876_v18 = vcombine.low %v5392_v53, %v2873_v1  ;;  %v2776_v57 = vsel %vm2775_vm6, %v2773_v32, %v2774_v24  ;;  %v2788_v21 = vsel %vm2787_vm14, %v2784_v62, %v4809_v38  ;;  %v2790_v28 = vsel %vm2789_vm15, %v2786_v25, %v4815_v31 }
 0x2ba   : > { %v2777_v36 = vrot.slane %v2776_v57, 2  ;;  %vm2791_vm3 = vcmp.lt.s32.totalorder %v2788_v21, %v4823_v43  ;;  %vm2793_vm4 = vcmp.lt.s32.totalorder %v2790_v28, %v4829_v9  ;;  %v2901_v50 = vrot.slane %v5013_v13, %v5394_v40 }
 0x2bb   : > { %v2883_v34 = vrot.slane %v2876_v18, %v5393_v46  ;;  %v2792_v59 = vsel %vm2791_vm3, %v2788_v21, %v4823_v43  ;;  %v2794_v27 = vsel %vm2793_vm4, %v2790_v28, %v4829_v9  ;;  %vm5398_vm11 = vcmp.lt.f32.partialorder %v5396_v20, %v5397_v14 }
 0x2bc   : > { %vm2778_vm5 = vcmp.lt.s32.totalorder %v2776_v57, %v2777_v36  ;;  %vm2795_vm7 = vcmp.lt.s32.totalorder %v2792_v59, %v4837_v44  ;;  %vm2797_vm8 = vcmp.lt.s32.totalorder %v2794_v27, %v4843_v51  ;;  %v5399_v5 = vsub.s32 1, %v4347_v16 }
 0x2bd   : > { %v2890_v38 = vrot.slane %v2883_v34, %v5393_v46  ;;  %v2779_v31 = vsel %vm2778_vm5, %v2776_v57, %v2777_v36  ;;  %v2796_v60 = vsel %vm2795_vm7, %v2792_v59, %v4837_v44  ;;  %v2798_v39 = vsel %vm2797_vm8, %v2794_v27, %v4843_v51 }
 0x2be   : > { %v2780_v63 = vrot.slane %v2779_v31, 1  ;;  %vm2799_vm2 = vcmp.lt.s32.totalorder %v2796_v60, %v4851_v33  ;;  %vm2801_vm9 = vcmp.lt.s32.totalorder %v2798_v39, %v4857_v35 }
 0x2bf   : > { %2896 = vst.msk [vmem:[#allocation2] sm:$0x3] %vm3452_vm0, %v2890_v38  ;;  %v2800_v9 = vsel %vm2799_vm2, %v2796_v60, %v4851_v33  ;;  %v2802_v49 = vsel %vm2801_vm9, %v2798_v39, %v4857_v35 }
 0x2c0   : > { %vm2781_vm13 = vcmp.lt.s32.totalorder %v2779_v31, %v2780_v63  ;;  %vm2803_vm10 = vcmp.lt.s32.totalorder %v2800_v9, %v4865_v47  ;;  %vm2805_vm12 = vcmp.lt.s32.totalorder %v2802_v49, %v4871_v45 }
 0x2c1   : > { %v2782_v44 = vsel %vm2781_vm13, %v2779_v31, %v2780_v63  ;;  %v2804_v51 = vsel %vm2803_vm10, %v2800_v9, %v4865_v47  ;;  %v2806_v4 = vsel %vm2805_vm12, %v2802_v49, %v4871_v45 }
 0x2c2   : > { %v2906_v0 = vsel %vm5398_vm11, %v2782_v44, %v2901_v50  ;;  %vm2807_vm6 = vcmp.lt.s32.totalorder %v2804_v51, %v4879_v3  ;;  %vm2809_vm14 = vcmp.lt.s32.totalorder %v2806_v4, %v4885_v23 }
 0x2c3   : > { %v2808_v33 = vsel %vm2807_vm6, %v2804_v51, %v4879_v3  ;;  %v2810_v35 = vsel %vm2809_vm14, %v2806_v4, %v4885_v23 }
 0x2c4   : > { %vm2811_vm15 = vcmp.lt.s32.totalorder %v2808_v33, %v4893_v6  ;;  %vm2813_vm3 = vcmp.lt.s32.totalorder %v2810_v35, %v4899_v30 }
 0x2c5   : > { %v2812_v47 = vsel %vm2811_vm15, %v2808_v33, %v4893_v6  ;;  %v2814_v45 = vsel %vm2813_vm3, %v2810_v35, %v4899_v30 }
 0x2c6   : > { %vm2815_vm4 = vcmp.lt.s32.totalorder %v2812_v47, %v4907_v37  ;;  %vm2817_vm5 = vcmp.lt.s32.totalorder %v2814_v45, %v4913_v41 }
 0x2c7   : > { %v2816_v54 = vsel %vm2815_vm4, %v2812_v47, %v4907_v37  ;;  %v2818_v52 = vsel %vm2817_vm5, %v2814_v45, %v4913_v41 }
 0x2c8   : > { %vm2819_vm7 = vcmp.lt.s32.totalorder %v2816_v54, %v4921_v29  ;;  %vm2821_vm8 = vcmp.lt.s32.totalorder %v2818_v52, %v4927_v26 }
 0x2c9   : > { %v2820_v3 = vsel %vm2819_vm7, %v2816_v54, %v4921_v29  ;;  %v2822_v23 = vsel %vm2821_vm8, %v2818_v52, %v4927_v26 }
 0x2ca   : > { %vm2823_vm2 = vcmp.lt.s32.totalorder %v2820_v3, %v4935_v22  ;;  %vm2825_vm9 = vcmp.lt.s32.totalorder %v2822_v23, %v4941_v56 }
 0x2cb   : > { %v2824_v6 = vsel %vm2823_vm2, %v2820_v3, %v4935_v22  ;;  %v2826_v30 = vsel %vm2825_vm9, %v2822_v23, %v4941_v56 }
 0x2cc   : > { %vm2827_vm13 = vcmp.lt.s32.totalorder %v2824_v6, %v4949_v12  ;;  %vm2829_vm10 = vcmp.lt.s32.totalorder %v2826_v30, %v4955_v58 }
 0x2cd   : > { %v2828_v37 = vsel %vm2827_vm13, %v2824_v6, %v4949_v12  ;;  %v2830_v41 = vsel %vm2829_vm10, %v2826_v30, %v4955_v58 }
 0x2ce   : > { %vm2831_vm12 = vcmp.lt.s32.totalorder %v2828_v37, %v4961_v2  ;;  %vm2833_vm11 = vcmp.lt.s32.totalorder %v2830_v41, %v4967_v11 }
 0x2cf   : > { %v2832_v29 = vsel %vm2831_vm12, %v2828_v37, %v4961_v2  ;;  %v2834_v26 = vsel %vm2833_vm11, %v2830_v41, %v4967_v11 }
 0x2d0   : > { %vm2835_vm6 = vcmp.lt.s32.totalorder %v2832_v29, %v4973_v42  ;;  %vm2837_vm14 = vcmp.lt.s32.totalorder %v2834_v26, %v4979_v55 }
 0x2d1   : > { %v2836_v22 = vsel %vm2835_vm6, %v2832_v29, %v4973_v42  ;;  %v2838_v56 = vsel %vm2837_vm14, %v2834_v26, %v4979_v55  ;;  %v2905_v55 = vrot.slane %v5013_v13, %v5399_v5 }
 0x2d2   : > { %vm2839_vm15 = vcmp.lt.s32.totalorder %v2836_v22, %v4985_v15  ;;  %vm2841_vm3 = vcmp.lt.s32.totalorder %v2838_v56, %v4991_v48 }
 0x2d3   : > { %v2840_v12 = vsel %vm2839_vm15, %v2836_v22, %v4985_v15  ;;  %v2842_v58 = vsel %vm2841_vm3, %v2838_v56, %v4991_v48 }
 0x2d4   : > { %vm2843_vm4 = vcmp.lt.s32.totalorder %v2840_v12, %v2842_v58 }
 0x2d5   : > { %v2844_v2 = vsel %vm2843_vm4, %v2840_v12, %v2842_v58 }
 0x2d6   : > { %v2845_v7 = vrot.slane %v2844_v2, 4 }
 0x2d8   : > { %vm2846_vm5 = vcmp.lt.s32.totalorder %v2844_v2, %v2845_v7 }
 0x2d9   : > { %v2847_v11 = vsel %vm2846_vm5, %v2844_v2, %v2845_v7 }
 0x2da   : > { %v2848_v19 = vrot.slane %v2847_v11, 2 }
 0x2dc   : > { %vm2849_vm7 = vcmp.lt.s32.totalorder %v2847_v11, %v2848_v19 }
 0x2dd   : > { %v2850_v32 = vsel %vm2849_vm7, %v2847_v11, %v2848_v19 }
 0x2de   : > { %v2851_v42 = vrot.slane %v2850_v32, 1 }
 0x2e0   : > { %vm2852_vm8 = vcmp.lt.s32.totalorder %v2850_v32, %v2851_v42 }
 0x2e1   : > { %v2853_v10 = vsel %vm2852_vm8, %v2850_v32, %v2851_v42 }
 0x2e2   : > { %v2907_v15 = vsel %vm2871_vm1, %v2853_v10, %v2905_v55 }
 0x2e3   : > { %v2908_v17 = vcombine.low %v2906_v0, %v2907_v15 }
 0x2e5   : > { %v2915_v48 = vrot.slane %v2908_v17, %v5393_v46 }
 0x2e7   : > { %v2922_v24 = vrot.slane %v2915_v48, %v5393_v46 }
 0x2e9   : > { %2923 = vst.msk [vmem:[%s3470_s24] sm:$0x3] %vm3452_vm0, %v2922_v24 }
 0x2ea PF: > { %s12_s11 = sadd.s32 1, %s3410_s11   ;;  %s5400_s9 = smov %s3406_s10 }
 0x2eb   : > { %p9_p5 = scmp.ge.s32.totalorder %s12_s11, 4   ;;  %s5401_s10 = smov %s5403_s12 }
 0x2ed   :  { %11 = sbr.rel (!%p9_p5) target bundleno = 2 (0x2), region = 65 }

</bundles_post_ra>
